<compile_context>
chip_gen: v7x
topology: tpu7x:2x2x1
jax: 0.10.0
libtpu: 0.0.40
codegen_flags: <defaults>
</compile_context>

<pallas_src>
import functools

import jax
import jax.numpy as jnp
from jax.experimental import pallas as pl
from jax.experimental.pallas import tpu as pltpu

# Above the 16/32 MiB scoped-VMEM defaults (v5e / v6e-v7x) so the larger row
# tiles fit, and safely below v7x's 64 MiB physical VMEM.
_VMEM_LIMIT_BYTES = 48 * 1024 * 1024


# ------------------------------- helpers ------------------------------------


def _tile(dim, target, align):
    """Largest tile <= target that divides dim and is a multiple of align,
    else the full dim (always legal for a BlockSpec)."""
    if dim <= target:
        return dim
    t = (target // align) * align
    while t >= align:
        if dim % t == 0:
            return t
        t -= align
    return dim


def _row_tile(m, target, align=8):
    """Row tile; avoid a single row tile (keep >= 2 'parallel' grid steps so
    both v7x TensorCores get work) when the dimension allows it."""
    t = _tile(m, target, align)
    if m > align and m // t < 2:
        t2 = _tile(m, max(align, m // 2), align)
        if m // t2 >= 2:
            t = t2
    return t


def _gelu(x):
    # FasterTransformer fast gelu (tanh approximation), computed in f32.
    return 0.5 * x * (1.0 + jnp.tanh(0.7978845608028654 *
                                     (x + 0.044715 * x * x * x)))


def _params(semantics):
    return pltpu.CompilerParams(dimension_semantics=semantics,
                                vmem_limit_bytes=_VMEM_LIMIT_BYTES)


# ----------------------------- Pallas kernels -------------------------------


def _matmul_bias_kernel(x_ref, w_ref, b_ref, o_ref):
    y = jnp.dot(x_ref[...], w_ref[...], preferred_element_type=jnp.float32)
    o_ref[...] = (y + b_ref[...].astype(jnp.float32)).astype(o_ref.dtype)


def matmul_bias(x, w, b, *, tm_target=512, tn_target=1024,
                whole_weight_bytes=12 * 1024 * 1024):
    """y = x @ w + b.  x: (M, K), w: (K, N), b: (1, N).

    If the whole (K, N) weight fits a modest VMEM budget it is kept as a
    single grid-invariant block, so it is DMA'd from HBM exactly once per
    layer regardless of how many row tiles stream past it."""
    M, K = x.shape
    _, N = w.shape
    tm = _row_tile(M, tm_target)
    if K * N * w.dtype.itemsize <= whole_weight_bytes:
        tn = N
    else:
        tn = _tile(N, tn_target, 128)
    return pl.pallas_call(
        _matmul_bias_kernel,
        out_shape=jax.ShapeDtypeStruct((M, N), x.dtype),
        grid_spec=pltpu.PrefetchScalarGridSpec(
            num_scalar_prefetch=0,
            grid=(M // tm, N // tn),
            in_specs=[
                pl.BlockSpec((tm, K), lambda i, j: (i, 0)),
                pl.BlockSpec((K, tn), lambda i, j: (0, j)),
                pl.BlockSpec((1, tn), lambda i, j: (0, j)),
            ],
            out_specs=pl.BlockSpec((tm, tn), lambda i, j: (i, j)),
        ),
        compiler_params=_params(("parallel", "parallel")),
    )(x, w, b)


def _dense_add_ln_kernel(x_ref, w_ref, b_ref, r_ref, g_ref, bt_ref, o_ref,
                         acc_ref, *, eps):
    k = pl.program_id(1)

    @pl.when(k == 0)
    def _():
        acc_ref[...] = jnp.zeros_like(acc_ref)

    acc_ref[...] += jnp.dot(x_ref[...], w_ref[...],
                            preferred_element_type=jnp.float32)

    @pl.when(k == pl.num_programs(1) - 1)
    def _():
        y = (acc_ref[...] + b_ref[...].astype(jnp.float32)
             + r_ref[...].astype(jnp.float32))
        mu = jnp.mean(y, axis=-1, keepdims=True)
        d = y - mu
        var = jnp.mean(d * d, axis=-1, keepdims=True)
        yn = d * jax.lax.rsqrt(var + eps)
        o_ref[...] = (yn * g_ref[...].astype(jnp.float32)
                      + bt_ref[...].astype(jnp.float32)).astype(o_ref.dtype)


def dense_add_layernorm(x, w, b, residual, gamma, beta, *, eps=1e-6,
                        tm_target=512, tk_target=512):
    """layernorm(x @ w + b + residual), K-tiled with a f32 accumulator so the
    weight block stays bounded (portable to v7x's 64 MiB VMEM)."""
    M, K = x.shape
    _, N = w.shape
    tm = _row_tile(M, tm_target)
    tk = _tile(K, tk_target, 128)
    kernel = functools.partial(_dense_add_ln_kernel, eps=eps)
    return pl.pallas_call(
        kernel,
        out_shape=jax.ShapeDtypeStruct((M, N), x.dtype),
        grid_spec=pltpu.PrefetchScalarGridSpec(
            num_scalar_prefetch=0,
            grid=(M // tm, K // tk),
            in_specs=[
                pl.BlockSpec((tm, tk), lambda i, k: (i, k)),   # x
                pl.BlockSpec((tk, N), lambda i, k: (k, 0)),    # weight
                pl.BlockSpec((1, N), lambda i, k: (0, 0)),     # bias
                pl.BlockSpec((tm, N), lambda i, k: (i, 0)),    # residual
                pl.BlockSpec((1, N), lambda i, k: (0, 0)),     # gamma
                pl.BlockSpec((1, N), lambda i, k: (0, 0)),     # beta
            ],
            out_specs=pl.BlockSpec((tm, N), lambda i, k: (i, 0)),
            scratch_shapes=[pltpu.VMEM((tm, N), jnp.float32)],
        ),
        compiler_params=_params(("parallel", "arbitrary")),
    )(x, w, b, residual, gamma, beta)


def _ffn_kernel(x_ref, iw_ref, ib_ref, ow_ref, ob_ref, g_ref, bt_ref, o_ref,
                acc_ref, *, eps):
    j = pl.program_id(1)

    @pl.when(j == 0)
    def _():
        acc_ref[...] = jnp.zeros_like(acc_ref)

    h = jnp.dot(x_ref[...], iw_ref[...], preferred_element_type=jnp.float32)
    h = _gelu(h + ib_ref[...].astype(jnp.float32))
    acc_ref[...] += jnp.dot(h.astype(ow_ref.dtype), ow_ref[...],
                            preferred_element_type=jnp.float32)

    @pl.when(j == pl.num_programs(1) - 1)
    def _():
        # x_ref is also the residual for the second add & layernorm.
        y = (acc_ref[...] + ob_ref[...].astype(jnp.float32)
             + x_ref[...].astype(jnp.float32))
        mu = jnp.mean(y, axis=-1, keepdims=True)
        d = y - mu
        var = jnp.mean(d * d, axis=-1, keepdims=True)
        yn = d * jax.lax.rsqrt(var + eps)
        o_ref[...] = (yn * g_ref[...].astype(jnp.float32)
                      + bt_ref[...].astype(jnp.float32)).astype(o_ref.dtype)


def ffn_add_layernorm(x, iw, ib, ow, ob, gamma, beta, *, eps=1e-6,
                      tm_target=512, ti_target=1024):
    """layernorm(gelu(x @ iw + ib) @ ow + ob + x).

    The (M, intermediate) activation never leaves VMEM: the intermediate
    dimension is a reduction grid axis with a f32 accumulator."""
    M, K = x.shape
    _, I = iw.shape
    tm = _row_tile(M, tm_target)
    ti = _tile(I, ti_target, 128)
    kernel = functools.partial(_ffn_kernel, eps=eps)
    return pl.pallas_call(
        kernel,
        out_shape=jax.ShapeDtypeStruct((M, K), x.dtype),
        grid_spec=pltpu.PrefetchScalarGridSpec(
            num_scalar_prefetch=0,
            grid=(M // tm, I // ti),
            in_specs=[
                pl.BlockSpec((tm, K), lambda i, j: (i, 0)),    # x / residual
                pl.BlockSpec((K, ti), lambda i, j: (0, j)),    # intermediate W
                pl.BlockSpec((1, ti), lambda i, j: (0, j)),    # intermediate b
                pl.BlockSpec((ti, K), lambda i, j: (j, 0)),    # output W
                pl.BlockSpec((1, K), lambda i, j: (0, 0)),     # output b
                pl.BlockSpec((1, K), lambda i, j: (0, 0)),     # gamma
                pl.BlockSpec((1, K), lambda i, j: (0, 0)),     # beta
            ],
            out_specs=pl.BlockSpec((tm, K), lambda i, j: (i, 0)),
            scratch_shapes=[pltpu.VMEM((tm, K), jnp.float32)],
        ),
        compiler_params=_params(("parallel", "arbitrary")),
    )(x, iw, ib, ow, ob, gamma, beta)


def _flash_attn_kernel(q_ref, k_ref, v_ref, bias_ref, o_ref,
                       m_sc, l_sc, acc_sc, *, hp, head_dim, k_off, v_off):
    ki = pl.program_id(3)

    @pl.when(ki == 0)
    def _():
        m_sc[...] = jnp.full_like(m_sc, -jnp.inf)
        l_sc[...] = jnp.zeros_like(l_sc)
        acc_sc[...] = jnp.zeros_like(acc_sc)

    qb = q_ref[0]                                 # (tq, Wq)
    kb = k_ref[0]                                 # (tk, Wk)
    vb = v_ref[0]                                 # (tk, Wk)
    bias = bias_ref[0].astype(jnp.float32)        # (tq, tk) additive mask bias

    for h in range(hp):                           # static unroll over heads
        lo = h * head_dim
        hi = lo + head_dim
        qh = qb[:, lo:hi]                         # (tq, D); 1/sqrt(D) folded in
        kh = kb[:, k_off + lo:k_off + hi]         # (tk, D)
        vh = vb[:, v_off + lo:v_off + hi]         # (tk, D)

        s = jax.lax.dot_general(                  # q @ k^T, f32 accumulation
            qh, kh, dimension_numbers=(((1,), (1,)), ((), ())),
            preferred_element_type=jnp.float32)   # (tq, tk)
        s = s + bias

        m_prev = m_sc[h]
        m_new = jnp.maximum(m_prev, jnp.max(s, axis=-1, keepdims=True))
        alpha = jnp.exp(m_prev - m_new)
        p = jnp.exp(s - m_new)
        l_sc[h] = alpha * l_sc[h] + jnp.sum(p, axis=-1, keepdims=True)
        acc_sc[h] = alpha * acc_sc[h] + jnp.dot(
            p.astype(vh.dtype), vh, preferred_element_type=jnp.float32)
        m_sc[h] = m_new

    @pl.when(ki == pl.num_programs(3) - 1)
    def _():
        # One lane-dense (tq, hp*D) store; exact (non-approx) normalization.
        outs = [(acc_sc[h] / l_sc[h]).astype(o_ref.dtype) for h in range(hp)]
        o_ref[0] = outs[0] if hp == 1 else jnp.concatenate(outs, axis=-1)


def flash_attention(qkv, mask_bias, head_num, head_size, *,
                    tq_target=512, tk_target=1024):
    """Flash attention reading a fused (B, S, 3*hidden) QKV tensor directly.

    qkv columns are [Q_h0..Q_h{H-1} | K_h0.. | V_h0..] (D wide per head);
    mask_bias is the additive (B, S, S) bias (mask - 1) * 10000.  The output
    is written directly in (B, S, hidden) layout, so the wrapper needs no
    XLA transposes around attention."""
    B, S, W3 = qkv.shape
    hidden = head_num * head_size
    assert W3 == 3 * hidden
    tq = _tile(S, tq_target, 8)
    tk = _tile(S, tk_target, 128)

    # Smallest head group whose lane width hp*D is a multiple of 128.
    hp = None
    for cand in range(1, head_num + 1):
        if head_num % cand == 0 and (cand * head_size) % 128 == 0:
            hp = cand
            break

    if hp is not None:
        grp = head_num // hp
        wq = hp * head_size
        k_off, v_off = 0, 0
        q_spec = pl.BlockSpec((1, tq, wq), lambda b, g, qi, ki: (b, qi, g))
        k_spec = pl.BlockSpec((1, tk, wq),
                              lambda b, g, qi, ki: (b, ki, grp + g))
        v_spec = pl.BlockSpec((1, tk, wq),
                              lambda b, g, qi, ki: (b, ki, 2 * grp + g))
        out_w = wq
        out_spec = pl.BlockSpec((1, tq, out_w),
                                lambda b, g, qi, ki: (b, qi, g))
    else:
        # TODO(synk): head sizes whose lane width cannot be made a multiple of
        # 128 use full-row QKV blocks (layout-legal) and slice in-kernel; this
        # re-reads some QKV columns but only triggers for non-BERT geometries.
        hp, grp = head_num, 1
        wq = 3 * hidden
        k_off, v_off = hidden, 2 * hidden
        q_spec = pl.BlockSpec((1, tq, wq), lambda b, g, qi, ki: (b, qi, 0))
        k_spec = pl.BlockSpec((1, tk, wq), lambda b, g, qi, ki: (b, ki, 0))
        v_spec = pl.BlockSpec((1, tk, wq), lambda b, g, qi, ki: (b, ki, 0))
        out_w = hidden
        out_spec = pl.BlockSpec((1, tq, out_w),
                                lambda b, g, qi, ki: (b, qi, 0))

    kernel = functools.partial(_flash_attn_kernel, hp=hp, head_dim=head_size,
                               k_off=k_off, v_off=v_off)
    return pl.pallas_call(
        kernel,
        out_shape=jax.ShapeDtypeStruct((B, S, hidden), qkv.dtype),
        grid_spec=pltpu.PrefetchScalarGridSpec(
            num_scalar_prefetch=0,
            grid=(B, grp, S // tq, S // tk),
            in_specs=[
                q_spec, k_spec, v_spec,
                pl.BlockSpec((1, tq, tk), lambda b, g, qi, ki: (b, qi, ki)),
            ],
            out_specs=out_spec,
            scratch_shapes=[
                pltpu.VMEM((hp, tq, 1), jnp.float32),           # running max
                pltpu.VMEM((hp, tq, 1), jnp.float32),           # running denom
                pltpu.VMEM((hp, tq, head_size), jnp.float32),   # running acc
            ],
        ),
        compiler_params=_params(
            ("parallel", "parallel", "parallel", "arbitrary")),
    )(qkv, qkv, qkv, mask_bias)


# --------------------------- Encoder layer / stack ---------------------------


def _encoder_layer(x, mask_bias, w, B, S, head_num, head_size, eps):
    hidden = head_num * head_size

    # Fused Q/K/V projection (scale pre-folded into the Q columns).
    qkv = matmul_bias(x, w["qkv_w"], w["qkv_b"])            # (B*S, 3*hidden)

    # Flash attention straight from the QKV layout; output is (B, S, hidden).
    ctx = flash_attention(qkv.reshape(B, S, 3 * hidden), mask_bias,
                          head_num, head_size)
    ctx = ctx.reshape(B * S, hidden)

    # Attention-output dense fused with add & layernorm (residual = x).
    h1 = dense_add_layernorm(ctx, w["ao_w"], w["ao_b"], x,
                             w["ln1_g"], w["ln1_b"], eps=eps)

    # FFN fully fused (gelu matmul + output matmul + add & layernorm).
    h2 = ffn_add_layernorm(h1, w["i_w"], w["i_b"], w["o_w"], w["o_b"],
                           w["ln2_g"], w["ln2_b"], eps=eps)
    return h2


def _encoder_forward(hidden_states, attention_mask, layers, *, head_num,
                     head_size, compute_dtype, eps):
    B, S, hidden = hidden_states.shape
    in_dtype = hidden_states.dtype
    x = hidden_states.reshape(B * S, hidden).astype(compute_dtype)
    # Additive mask bias computed once per forward, in the compute dtype
    # (halves the per-head-group mask traffic vs. a dense f32 0/1 mask).
    mask_bias = ((attention_mask.astype(jnp.float32) - 1.0)
                 * 10000.0).astype(compute_dtype)
    for w in layers:
        x = _encoder_layer(x, mask_bias, w, B, S, head_num, head_size, eps)
    return (x.reshape(B, S, hidden).astype(in_dtype),)


def _prepare_layer(w, head_size, compute_dtype):
    """Pack per-layer weights: fused QKV weight with 1/sqrt(D) folded into the
    Q columns, bf16 matmul weights, f32 biases / layernorm params."""
    hidden = w["q_w"].shape[0]
    scale = 1.0 / float(head_size) ** 0.5
    return {
        "qkv_w": jnp.concatenate([w["q_w"] * scale, w["k_w"], w["v_w"]],
                                 axis=1).astype(compute_dtype),
        "qkv_b": jnp.concatenate([w["q_b"] * scale, w["k_b"], w["v_b"]]
                                 ).reshape(1, 3 * hidden).astype(jnp.float32),
        "ao_w": w["ao_w"].astype(compute_dtype),
        "ao_b": w["ao_b"].reshape(1, -1).astype(jnp.float32),
        "ln1_g": w["ln1_g"].reshape(1, -1).astype(jnp.float32),
        "ln1_b": w["ln1_b"].reshape(1, -1).astype(jnp.float32),
        "i_w": w["i_w"].astype(compute_dtype),
        "i_b": w["i_b"].reshape(1, -1).astype(jnp.float32),
        "o_w": w["o_w"].astype(compute_dtype),
        "o_b": w["o_b"].reshape(1, -1).astype(jnp.float32),
        "ln2_g": w["ln2_g"].reshape(1, -1).astype(jnp.float32),
        "ln2_b": w["ln2_b"].reshape(1, -1).astype(jnp.float32),
    }


class CustomEncoder:
    """JAX/Pallas port of FasterTransformer CustomEncoder (BERT layer stack)."""

    def __init__(self, layer_num, head_num, head_size, weights,
                 compute_dtype=jnp.bfloat16, layernorm_eps=1e-6):
        self.layer_num = layer_num
        self.head_num = head_num
        self.head_size = head_size
        self.layers = [_prepare_layer(w, head_size, compute_dtype)
                       for w in weights]
        self._forward = jax.jit(functools.partial(
            _encoder_forward, head_num=head_num, head_size=head_size,
            compute_dtype=compute_dtype, eps=layernorm_eps))

    def __call__(self, hidden_states, attention_mask, sequence_lengths=None):
        # TODO(synk): remove_padding / sequence_lengths is a CUDA-side packing
        # optimization; semantics here match remove_padding=False.
        return self._forward(hidden_states, attention_mask, self.layers)


# ------------------------------ test harness --------------------------------


def make_layer_weights(key, hidden, inter):
    ks = jax.random.split(key, 6)
    std = 0.02
    return {
        "q_w": jax.random.normal(ks[0], (hidden, hidden), jnp.float32) * std,
        "q_b": jnp.zeros((hidden,), jnp.float32),
        "k_w": jax.random.normal(ks[1], (hidden, hidden), jnp.float32) * std,
        "k_b": jnp.zeros((hidden,), jnp.float32),
        "v_w": jax.random.normal(ks[2], (hidden, hidden), jnp.float32) * std,
        "v_b": jnp.zeros((hidden,), jnp.float32),
        "ao_w": jax.random.normal(ks[3], (hidden, hidden), jnp.float32) * std,
        "ao_b": jnp.zeros((hidden,), jnp.float32),
        "ln1_g": jnp.ones((hidden,), jnp.float32),
        "ln1_b": jnp.zeros((hidden,), jnp.float32),
        "i_w": jax.random.normal(ks[4], (hidden, inter), jnp.float32) * std,
        "i_b": jnp.zeros((inter,), jnp.float32),
        "o_w": jax.random.normal(ks[5], (inter, hidden), jnp.float32) * std,
        "o_b": jnp.zeros((hidden,), jnp.float32),
        "ln2_g": jnp.ones((hidden,), jnp.float32),
        "ln2_b": jnp.zeros((hidden,), jnp.float32),
    }


def _reference_forward(hidden_states, attention_mask, layers, head_num,
                       head_size, eps):
    """Pure-jnp f32 reference using the same packed (scale-folded) weights."""
    B, S, hidden = hidden_states.shape
    x = hidden_states.astype(jnp.float32).reshape(B * S, hidden)
    bias = (attention_mask.astype(jnp.float32) - 1.0) * 10000.0

    def ln(y, g, b):
        mu = y.mean(-1, keepdims=True)
        d = y - mu
        var = (d * d).mean(-1, keepdims=True)
        return d * jax.lax.rsqrt(var + eps) * g[0] + b[0]

    for w in layers:
        qkv = (x @ w["qkv_w"].astype(jnp.float32)
               + w["qkv_b"].astype(jnp.float32)[0])
        qkv = qkv.reshape(B, S, 3, head_num, head_size)
        q = qkv[:, :, 0].transpose(0, 2, 1, 3)     # (B, H, S, D); scale folded
        k = qkv[:, :, 1].transpose(0, 2, 1, 3)
        v = qkv[:, :, 2].transpose(0, 2, 1, 3)
        s = jnp.einsum("bhqd,bhkd->bhqk", q, k) + bias[:, None]
        p = jax.nn.softmax(s, axis=-1)
        ctx = jnp.einsum("bhqk,bhkd->bhqd", p, v)
        ctx = ctx.transpose(0, 2, 1, 3).reshape(B * S, hidden)
        h1 = ln(ctx @ w["ao_w"].astype(jnp.float32)
                + w["ao_b"].astype(jnp.float32)[0] + x,
                w["ln1_g"], w["ln1_b"])
        hmid = _gelu(h1 @ w["i_w"].astype(jnp.float32)
                     + w["i_b"].astype(jnp.float32)[0])
        x = ln(hmid @ w["o_w"].astype(jnp.float32)
               + w["o_b"].astype(jnp.float32)[0] + h1,
               w["ln2_g"], w["ln2_b"])
    return x.reshape(B, S, hidden)


if __name__ == "__main__":
    # Small but lane-aligned BERT-like geometry (head_size=64 so that a head
    # group of 2 heads gives a 128-wide, lane-dense attention block).
    layer_num = 2
    head_num = 2
    head_size = 64
    hidden = head_num * head_size      # 128
    inter = 4 * hidden                 # 512
    batch = 2
    seq = 8

    root = jax.random.PRNGKey(0)
    k_h, k_w = jax.random.split(root)

    hidden_states = jax.random.normal(k_h, (batch, seq, hidden), jnp.float32)

    # Per-sequence valid lengths -> FT-style (B, S, S) mask (outer product of
    # token validity), 1.0 = attendable, 0.0 = padding.
    lengths = jnp.array([seq, 5], dtype=jnp.int32)
    pos = jnp.arange(seq)
    valid = (pos[None, :] < lengths[:, None]).astype(jnp.float32)    # (B, S)
    attention_mask = valid[:, :, None] * valid[:, None, :]           # (B, S, S)

    layer_keys = jax.random.split(k_w, layer_num)
    weights = [make_layer_weights(layer_keys[i], hidden, inter)
               for i in range(layer_num)]

    encoder = CustomEncoder(layer_num, head_num, head_size, weights)
    (out,) = encoder(hidden_states, attention_mask)
    out = jax.block_until_ready(out)

    assert out.shape == (batch, seq, hidden)
    assert bool(jnp.all(jnp.isfinite(out)))

    # Loose sanity check vs. a pure-jnp f32 reference (bf16 compute path).
    ref = _reference_forward(hidden_states, attention_mask, encoder.layers,
                             head_num, head_size, 1e-6)
    max_err = float(jnp.max(jnp.abs(out.astype(jnp.float32) - ref)))
    assert max_err < 0.2, f"max abs error vs reference too large: {max_err}"

    print("KERNEL_OK")
</pallas_src>

<mosaic_0001>
module attributes {stable_mosaic.version = 11 : i64} {
  func.func @_matmul_bias_kernel(%arg0: i32, %arg1: i32, %arg2: memref<8x128xbf16, #tpu.memory_space<vmem>>, %arg3: memref<128x384xbf16, #tpu.memory_space<vmem>>, %arg4: memref<1x384xf32, #tpu.memory_space<vmem>>, %arg5: memref<8x384xbf16, #tpu.memory_space<vmem>>) attributes {dimension_semantics = [#tpu.dimension_semantics<parallel>, #tpu.dimension_semantics<parallel>], iteration_bounds = array<i64: 2, 1>, scalar_prefetch = 0 : i64, scratch_operands = 0 : i64, tpu.core_type = #tpu.core_type<tc>, window_params = [{transform_indices = @transform_0, window_bounds = array<i64: 8, 128>}, {transform_indices = @transform_1, window_bounds = array<i64: 128, 384>}, {transform_indices = @transform_2, window_bounds = array<i64: 1, 384>}, {transform_indices = @transform_3, window_bounds = array<i64: 8, 384>}]} {
    %c0 = arith.constant 0 : index
    %c0_0 = arith.constant 0 : index
    %0 = vector.load %arg2[%c0, %c0_0] : memref<8x128xbf16, #tpu.memory_space<vmem>>, vector<8x128xbf16>
    %c0_1 = arith.constant 0 : index
    %c0_2 = arith.constant 0 : index
    %1 = vector.load %arg3[%c0_1, %c0_2] : memref<128x384xbf16, #tpu.memory_space<vmem>>, vector<128x384xbf16>
    %cst = arith.constant dense<0.000000e+00> : vector<8x384xf32>
    %2 = tpu.matmul %0, %1, %cst {dimension_numbers = #tpu.dot_dimension_numbers<[1], [0], [0], [1], [0, 0, 1, 1], [], []>} : vector<8x128xbf16>, vector<128x384xbf16>, vector<8x384xf32> -> vector<8x384xf32>
    %c0_3 = arith.constant 0 : index
    %c0_4 = arith.constant 0 : index
    %3 = vector.load %arg4[%c0_3, %c0_4] : memref<1x384xf32, #tpu.memory_space<vmem>>, vector<1x384xf32>
    %4 = vector.broadcast %3 : vector<1x384xf32> to vector<8x384xf32>
    %5 = arith.addf %2, %4 : vector<8x384xf32>
    %6 = arith.truncf %5 : vector<8x384xf32> to vector<8x384xbf16>
    %c0_5 = arith.constant 0 : index
    %c0_6 = arith.constant 0 : index
    %7 = vector.load %arg5[%c0_5, %c0_6] : memref<8x384xbf16, #tpu.memory_space<vmem>>, vector<8x384xbf16>
    tpu.vector_store %arg5[%c0_5, %c0_6], %6 {strides = array<i32>} : memref<8x384xbf16, #tpu.memory_space<vmem>>, vector<8x384xbf16>,
    return
  }
  func.func @transform_0(%arg0: i32, %arg1: i32) -> (i32, i32) {
    %c0_i32 = arith.constant 0 : i32
    %c0_i32_0 = arith.constant 0 : i32
    return %arg0, %c0_i32 : i32, i32
  }
  func.func @transform_1(%arg0: i32, %arg1: i32) -> (i32, i32) {
    %c0_i32 = arith.constant 0 : i32
    %c0_i32_0 = arith.constant 0 : i32
    return %c0_i32, %arg1 : i32, i32
  }
  func.func @transform_2(%arg0: i32, %arg1: i32) -> (i32, i32) {
    %c0_i32 = arith.constant 0 : i32
    %c0_i32_0 = arith.constant 0 : i32
    return %c0_i32, %arg1 : i32, i32
  }
  func.func @transform_3(%arg0: i32, %arg1: i32) -> (i32, i32) {
    %c0_i32 = arith.constant 0 : i32
    return %arg0, %arg1 : i32, i32
  }
}

module attributes {stable_mosaic.version = 11 : i64} {
  func.func @_flash_attn_kernel(%arg0: i32, %arg1: i32, %arg2: i32, %arg3: i32, %arg4: memref<1x8x128xbf16, #tpu.memory_space<vmem>>, %arg5: memref<1x8x128xbf16, #tpu.memory_space<vmem>>, %arg6: memref<1x8x128xbf16, #tpu.memory_space<vmem>>, %arg7: memref<1x8x8xbf16, #tpu.memory_space<vmem>>, %arg8: memref<1x8x128xbf16, #tpu.memory_space<vmem>>, %arg9: memref<2x8x1xf32, #tpu.memory_space<vmem>>, %arg10: memref<2x8x1xf32, #tpu.memory_space<vmem>>, %arg11: memref<2x8x64xf32, #tpu.memory_space<vmem>>) attributes {dimension_semantics = [#tpu.dimension_semantics<parallel>, #tpu.dimension_semantics<parallel>, #tpu.dimension_semantics<parallel>, #tpu.dimension_semantics<arbitrary>], iteration_bounds = array<i64: 2, 1, 1, 1>, scalar_prefetch = 0 : i64, scratch_operands = 3 : i64, tpu.core_type = #tpu.core_type<tc>, window_params = [{transform_indices = @transform_0, window_bounds = array<i64: 1, 8, 128>}, {transform_indices = @transform_1, window_bounds = array<i64: 1, 8, 128>}, {transform_indices = @transform_2, window_bounds = array<i64: 1, 8, 128>}, {transform_indices = @transform_3, window_bounds = array<i64: 1, 8, 8>}, {transform_indices = @transform_4, window_bounds = array<i64: 1, 8, 128>}]} {
    %c0_i32 = arith.constant 0 : i32
    %0 = arith.cmpi eq, %arg3, %c0_i32 : i32
    %1 = arith.extui %0 : i1 to i32
    %c0_i32_0 = arith.constant 0 : i32
    %2 = arith.cmpi ne, %1, %c0_i32_0 : i32
    scf.if %2 {
      %cst_56 = arith.constant 0xFF800000 : f32
      %89 = vector.broadcast %cst_56 : f32 to vector<2x8x1xf32>
      %c0_57 = arith.constant 0 : index
      %c0_58 = arith.constant 0 : index
      %c0_59 = arith.constant 0 : index
      %90 = vector.load %arg9[%c0_57, %c0_58, %c0_59] : memref<2x8x1xf32, #tpu.memory_space<vmem>>, vector<2x8x1xf32>
      tpu.vector_store %arg9[%c0_57, %c0_58, %c0_59], %89 {strides = array<i32>} : memref<2x8x1xf32, #tpu.memory_space<vmem>>, vector<2x8x1xf32>,
      %cst_60 = arith.constant 0.000000e+00 : f32
      %91 = vector.broadcast %cst_60 : f32 to vector<2x8x1xf32>
      %c0_61 = arith.constant 0 : index
      %c0_62 = arith.constant 0 : index
      %c0_63 = arith.constant 0 : index
      %92 = vector.load %arg10[%c0_61, %c0_62, %c0_63] : memref<2x8x1xf32, #tpu.memory_space<vmem>>, vector<2x8x1xf32>
      tpu.vector_store %arg10[%c0_61, %c0_62, %c0_63], %91 {strides = array<i32>} : memref<2x8x1xf32, #tpu.memory_space<vmem>>, vector<2x8x1xf32>,
      %cst_64 = arith.constant 0.000000e+00 : f32
      %93 = vector.broadcast %cst_64 : f32 to vector<2x8x64xf32>
      %c0_65 = arith.constant 0 : index
      %c0_66 = arith.constant 0 : index
      %c0_67 = arith.constant 0 : index
      %94 = vector.load %arg11[%c0_65, %c0_66, %c0_67] : memref<2x8x64xf32, #tpu.memory_space<vmem>>, vector<2x8x64xf32>
      tpu.vector_store %arg11[%c0_65, %c0_66, %c0_67], %93 {strides = array<i32>} : memref<2x8x64xf32, #tpu.memory_space<vmem>>, vector<2x8x64xf32>,
    } else {
    }
    %c0 = arith.constant 0 : index
    %c0_1 = arith.constant 0 : index
    %c0_2 = arith.constant 0 : index
    %3 = vector.load %arg4[%c0, %c0_1, %c0_2] : memref<1x8x128xbf16, #tpu.memory_space<vmem>>, vector<1x8x128xbf16>
    %4 = vector.shape_cast %3 : vector<1x8x128xbf16> to vector<8x128xbf16>
    %c0_3 = arith.constant 0 : index
    %c0_4 = arith.constant 0 : index
    %c0_5 = arith.constant 0 : index
    %5 = vector.load %arg5[%c0_3, %c0_4, %c0_5] : memref<1x8x128xbf16, #tpu.memory_space<vmem>>, vector<1x8x128xbf16>
    %6 = vector.shape_cast %5 : vector<1x8x128xbf16> to vector<8x128xbf16>
    %c0_6 = arith.constant 0 : index
    %c0_7 = arith.constant 0 : index
    %c0_8 = arith.constant 0 : index
    %7 = vector.load %arg6[%c0_6, %c0_7, %c0_8] : memref<1x8x128xbf16, #tpu.memory_space<vmem>>, vector<1x8x128xbf16>
    %8 = vector.shape_cast %7 : vector<1x8x128xbf16> to vector<8x128xbf16>
    %c0_9 = arith.constant 0 : index
    %c0_10 = arith.constant 0 : index
    %c0_11 = arith.constant 0 : index
    %9 = vector.load %arg7[%c0_9, %c0_10, %c0_11] : memref<1x8x8xbf16, #tpu.memory_space<vmem>>, vector<1x8x8xbf16>
    %10 = vector.shape_cast %9 : vector<1x8x8xbf16> to vector<8x8xbf16>
    %11 = arith.extf %10 : vector<8x8xbf16> to vector<8x8xf32>
    %12 = vector.extract_strided_slice %4 {offsets = [0, 0], sizes = [8, 64], strides = [1, 1]} : vector<8x128xbf16> to vector<8x64xbf16>
    %13 = vector.extract_strided_slice %6 {offsets = [0, 0], sizes = [8, 64], strides = [1, 1]} : vector<8x128xbf16> to vector<8x64xbf16>
    %14 = vector.extract_strided_slice %8 {offsets = [0, 0], sizes = [8, 64], strides = [1, 1]} : vector<8x128xbf16> to vector<8x64xbf16>
    %cst = arith.constant dense<0.000000e+00> : vector<8x8xf32>
    %15 = tpu.matmul %12, %13, %cst {dimension_numbers = #tpu.dot_dimension_numbers<[1], [1], [0], [0], [0, 0, 1, 0], [], []>} : vector<8x64xbf16>, vector<8x64xbf16>, vector<8x8xf32> -> vector<8x8xf32>
    %16 = arith.addf %15, %11 : vector<8x8xf32>
    %c0_12 = arith.constant 0 : index
    %c0_13 = arith.constant 0 : index
    %c0_14 = arith.constant 0 : index
    %17 = vector.load %arg9[%c0_12, %c0_13, %c0_14] : memref<2x8x1xf32, #tpu.memory_space<vmem>>, vector<1x8x1xf32>
    %18 = vector.shape_cast %17 : vector<1x8x1xf32> to vector<8x1xf32>
    %cst_15 = arith.constant dense<0xFF800000> : vector<8xf32>
    %19 = vector.multi_reduction <maximumf>, %16, %cst_15 [1] : vector<8x8xf32> to vector<8xf32>
    %20 = vector.shape_cast %19 : vector<8xf32> to vector<8x1xf32>
    %21 = arith.maximumf %18, %20 : vector<8x1xf32>
    %22 = arith.subf %18, %21 : vector<8x1xf32>
    %23 = math.exp %22 : vector<8x1xf32>
    %24 = vector.broadcast %21 : vector<8x1xf32> to vector<8x8xf32>
    %25 = arith.subf %16, %24 : vector<8x8xf32>
    %26 = math.exp %25 : vector<8x8xf32>
    %c0_16 = arith.constant 0 : index
    %c0_17 = arith.constant 0 : index
    %c0_18 = arith.constant 0 : index
    %27 = vector.load %arg10[%c0_16, %c0_17, %c0_18] : memref<2x8x1xf32, #tpu.memory_space<vmem>>, vector<1x8x1xf32>
    %28 = vector.shape_cast %27 : vector<1x8x1xf32> to vector<8x1xf32>
    %29 = arith.mulf %23, %28 : vector<8x1xf32>
    %cst_19 = arith.constant dense<0.000000e+00> : vector<8xf32>
    %30 = vector.multi_reduction <add>, %26, %cst_19 [1] : vector<8x8xf32> to vector<8xf32>
    %31 = vector.shape_cast %30 : vector<8xf32> to vector<8x1xf32>
    %32 = arith.addf %29, %31 : vector<8x1xf32>
    %c0_20 = arith.constant 0 : index
    %c0_21 = arith.constant 0 : index
    %c0_22 = arith.constant 0 : index
    %33 = vector.load %arg10[%c0_20, %c0_21, %c0_22] : memref<2x8x1xf32, #tpu.memory_space<vmem>>, vector<1x8x1xf32>
    %34 = vector.shape_cast %33 : vector<1x8x1xf32> to vector<8x1xf32>
    %35 = vector.shape_cast %32 : vector<8x1xf32> to vector<1x8x1xf32>
    tpu.vector_store %arg10[%c0_20, %c0_21, %c0_22], %35 {strides = array<i32>} : memref<2x8x1xf32, #tpu.memory_space<vmem>>, vector<1x8x1xf32>,
    %c0_23 = arith.constant 0 : index
    %c0_24 = arith.constant 0 : index
    %c0_25 = arith.constant 0 : index
    %36 = vector.load %arg11[%c0_23, %c0_24, %c0_25] : memref<2x8x64xf32, #tpu.memory_space<vmem>>, vector<1x8x64xf32>
    %37 = vector.shape_cast %36 : vector<1x8x64xf32> to vector<8x64xf32>
    %38 = vector.broadcast %23 : vector<8x1xf32> to vector<8x64xf32>
    %39 = arith.mulf %38, %37 : vector<8x64xf32>
    %40 = arith.truncf %26 : vector<8x8xf32> to vector<8x8xbf16>
    %cst_26 = arith.constant dense<0.000000e+00> : vector<8x64xf32>
    %41 = tpu.matmul %40, %14, %cst_26 {dimension_numbers = #tpu.dot_dimension_numbers<[1], [0], [0], [1], [0, 0, 1, 1], [], []>} : vector<8x8xbf16>, vector<8x64xbf16>, vector<8x64xf32> -> vector<8x64xf32>
    %42 = arith.addf %39, %41 : vector<8x64xf32>
    %c0_27 = arith.constant 0 : index
    %c0_28 = arith.constant 0 : index
    %c0_29 = arith.constant 0 : index
    %43 = vector.load %arg11[%c0_27, %c0_28, %c0_29] : memref<2x8x64xf32, #tpu.memory_space<vmem>>, vector<1x8x64xf32>
    %44 = vector.shape_cast %43 : vector<1x8x64xf32> to vector<8x64xf32>
    %45 = vector.shape_cast %42 : vector<8x64xf32> to vector<1x8x64xf32>
    tpu.vector_store %arg11[%c0_27, %c0_28, %c0_29], %45 {strides = array<i32>} : memref<2x8x64xf32, #tpu.memory_space<vmem>>, vector<1x8x64xf32>,
    %c0_30 = arith.constant 0 : index
    %c0_31 = arith.constant 0 : index
    %c0_32 = arith.constant 0 : index
    %46 = vector.load %arg9[%c0_30, %c0_31, %c0_32] : memref<2x8x1xf32, #tpu.memory_space<vmem>>, vector<1x8x1xf32>
    %47 = vector.shape_cast %46 : vector<1x8x1xf32> to vector<8x1xf32>
    %48 = vector.shape_cast %21 : vector<8x1xf32> to vector<1x8x1xf32>
    tpu.vector_store %arg9[%c0_30, %c0_31, %c0_32], %48 {strides = array<i32>} : memref<2x8x1xf32, #tpu.memory_space<vmem>>, vector<1x8x1xf32>,
    %49 = vector.extract_strided_slice %4 {offsets = [0, 64], sizes = [8, 64], strides = [1, 1]} : vector<8x128xbf16> to vector<8x64xbf16>
    %50 = vector.extract_strided_slice %6 {offsets = [0, 64], sizes = [8, 64], strides = [1, 1]} : vector<8x128xbf16> to vector<8x64xbf16>
    %51 = vector.extract_strided_slice %8 {offsets = [0, 64], sizes = [8, 64], strides = [1, 1]} : vector<8x128xbf16> to vector<8x64xbf16>
    %cst_33 = arith.constant dense<0.000000e+00> : vector<8x8xf32>
    %52 = tpu.matmul %49, %50, %cst_33 {dimension_numbers = #tpu.dot_dimension_numbers<[1], [1], [0], [0], [0, 0, 1, 0], [], []>} : vector<8x64xbf16>, vector<8x64xbf16>, vector<8x8xf32> -> vector<8x8xf32>
    %53 = arith.addf %52, %11 : vector<8x8xf32>
    %c1 = arith.constant 1 : index
    %c0_34 = arith.constant 0 : index
    %c0_35 = arith.constant 0 : index
    %54 = vector.load %arg9[%c1, %c0_34, %c0_35] : memref<2x8x1xf32, #tpu.memory_space<vmem>>, vector<1x8x1xf32>
    %55 = vector.shape_cast %54 : vector<1x8x1xf32> to vector<8x1xf32>
    %cst_36 = arith.constant dense<0xFF800000> : vector<8xf32>
    %56 = vector.multi_reduction <maximumf>, %53, %cst_36 [1] : vector<8x8xf32> to vector<8xf32>
    %57 = vector.shape_cast %56 : vector<8xf32> to vector<8x1xf32>
    %58 = arith.maximumf %55, %57 : vector<8x1xf32>
    %59 = arith.subf %55, %58 : vector<8x1xf32>
    %60 = math.exp %59 : vector<8x1xf32>
    %61 = vector.broadcast %58 : vector<8x1xf32> to vector<8x8xf32>
    %62 = arith.subf %53, %61 : vector<8x8xf32>
    %63 = math.exp %62 : vector<8x8xf32>
    %c1_37 = arith.constant 1 : index
    %c0_38 = arith.constant 0 : index
    %c0_39 = arith.constant 0 : index
    %64 = vector.load %arg10[%c1_37, %c0_38, %c0_39] : memref<2x8x1xf32, #tpu.memory_space<vmem>>, vector<1x8x1xf32>
    %65 = vector.shape_cast %64 : vector<1x8x1xf32> to vector<8x1xf32>
    %66 = arith.mulf %60, %65 : vector<8x1xf32>
    %cst_40 = arith.constant dense<0.000000e+00> : vector<8xf32>
    %67 = vector.multi_reduction <add>, %63, %cst_40 [1] : vector<8x8xf32> to vector<8xf32>
    %68 = vector.shape_cast %67 : vector<8xf32> to vector<8x1xf32>
    %69 = arith.addf %66, %68 : vector<8x1xf32>
    %c1_41 = arith.constant 1 : index
    %c0_42 = arith.constant 0 : index
    %c0_43 = arith.constant 0 : index
    %70 = vector.load %arg10[%c1_41, %c0_42, %c0_43] : memref<2x8x1xf32, #tpu.memory_space<vmem>>, vector<1x8x1xf32>
    %71 = vector.shape_cast %70 : vector<1x8x1xf32> to vector<8x1xf32>
    %72 = vector.shape_cast %69 : vector<8x1xf32> to vector<1x8x1xf32>
    tpu.vector_store %arg10[%c1_41, %c0_42, %c0_43], %72 {strides = array<i32>} : memref<2x8x1xf32, #tpu.memory_space<vmem>>, vector<1x8x1xf32>,
    %c1_44 = arith.constant 1 : index
    %c0_45 = arith.constant 0 : index
    %c0_46 = arith.constant 0 : index
    %73 = vector.load %arg11[%c1_44, %c0_45, %c0_46] : memref<2x8x64xf32, #tpu.memory_space<vmem>>, vector<1x8x64xf32>
    %74 = vector.shape_cast %73 : vector<1x8x64xf32> to vector<8x64xf32>
    %75 = vector.broadcast %60 : vector<8x1xf32> to vector<8x64xf32>
    %76 = arith.mulf %75, %74 : vector<8x64xf32>
    %77 = arith.truncf %63 : vector<8x8xf32> to vector<8x8xbf16>
    %cst_47 = arith.constant dense<0.000000e+00> : vector<8x64xf32>
    %78 = tpu.matmul %77, %51, %cst_47 {dimension_numbers = #tpu.dot_dimension_numbers<[1], [0], [0], [1], [0, 0, 1, 1], [], []>} : vector<8x8xbf16>, vector<8x64xbf16>, vector<8x64xf32> -> vector<8x64xf32>
    %79 = arith.addf %76, %78 : vector<8x64xf32>
    %c1_48 = arith.constant 1 : index
    %c0_49 = arith.constant 0 : index
    %c0_50 = arith.constant 0 : index
    %80 = vector.load %arg11[%c1_48, %c0_49, %c0_50] : memref<2x8x64xf32, #tpu.memory_space<vmem>>, vector<1x8x64xf32>
    %81 = vector.shape_cast %80 : vector<1x8x64xf32> to vector<8x64xf32>
    %82 = vector.shape_cast %79 : vector<8x64xf32> to vector<1x8x64xf32>
    tpu.vector_store %arg11[%c1_48, %c0_49, %c0_50], %82 {strides = array<i32>} : memref<2x8x64xf32, #tpu.memory_space<vmem>>, vector<1x8x64xf32>,
    %c1_51 = arith.constant 1 : index
    %c0_52 = arith.constant 0 : index
    %c0_53 = arith.constant 0 : index
    %83 = vector.load %arg9[%c1_51, %c0_52, %c0_53] : memref<2x8x1xf32, #tpu.memory_space<vmem>>, vector<1x8x1xf32>
    %84 = vector.shape_cast %83 : vector<1x8x1xf32> to vector<8x1xf32>
    %85 = vector.shape_cast %58 : vector<8x1xf32> to vector<1x8x1xf32>
    tpu.vector_store %arg9[%c1_51, %c0_52, %c0_53], %85 {strides = array<i32>} : memref<2x8x1xf32, #tpu.memory_space<vmem>>, vector<1x8x1xf32>,
    %c0_i32_54 = arith.constant 0 : i32
    %86 = arith.cmpi eq, %arg3, %c0_i32_54 : i32
    %87 = arith.extui %86 : i1 to i32
    %c0_i32_55 = arith.constant 0 : i32
    %88 = arith.cmpi ne, %87, %c0_i32_55 : i32
    scf.if %88 {
      %c0_56 = arith.constant 0 : index
      %c0_57 = arith.constant 0 : index
      %c0_58 = arith.constant 0 : index
      %89 = vector.load %arg11[%c0_56, %c0_57, %c0_58] : memref<2x8x64xf32, #tpu.memory_space<vmem>>, vector<1x8x64xf32>
      %90 = vector.shape_cast %89 : vector<1x8x64xf32> to vector<8x64xf32>
      %c0_59 = arith.constant 0 : index
      %c0_60 = arith.constant 0 : index
      %c0_61 = arith.constant 0 : index
      %91 = vector.load %arg10[%c0_59, %c0_60, %c0_61] : memref<2x8x1xf32, #tpu.memory_space<vmem>>, vector<1x8x1xf32>
      %92 = vector.shape_cast %91 : vector<1x8x1xf32> to vector<8x1xf32>
      %93 = vector.broadcast %92 : vector<8x1xf32> to vector<8x64xf32>
      %94 = arith.divf %90, %93 : vector<8x64xf32>
      %95 = arith.truncf %94 : vector<8x64xf32> to vector<8x64xbf16>
      %c1_62 = arith.constant 1 : index
      %c0_63 = arith.constant 0 : index
      %c0_64 = arith.constant 0 : index
      %96 = vector.load %arg11[%c1_62, %c0_63, %c0_64] : memref<2x8x64xf32, #tpu.memory_space<vmem>>, vector<1x8x64xf32>
      %97 = vector.shape_cast %96 : vector<1x8x64xf32> to vector<8x64xf32>
      %c1_65 = arith.constant 1 : index
      %c0_66 = arith.constant 0 : index
      %c0_67 = arith.constant 0 : index
      %98 = vector.load %arg10[%c1_65, %c0_66, %c0_67] : memref<2x8x1xf32, #tpu.memory_space<vmem>>, vector<1x8x1xf32>
      %99 = vector.shape_cast %98 : vector<1x8x1xf32> to vector<8x1xf32>
      %100 = vector.broadcast %99 : vector<8x1xf32> to vector<8x64xf32>
      %101 = arith.divf %97, %100 : vector<8x64xf32>
      %102 = arith.truncf %101 : vector<8x64xf32> to vector<8x64xbf16>
      %103 = tpu.concatenate %95, %102 in 1 : vector<8x64xbf16>, vector<8x64xbf16> -> vector<8x128xbf16>
      %c0_68 = arith.constant 0 : index
      %c0_69 = arith.constant 0 : index
      %c0_70 = arith.constant 0 : index
      %104 = vector.load %arg8[%c0_68, %c0_69, %c0_70] : memref<1x8x128xbf16, #tpu.memory_space<vmem>>, vector<1x8x128xbf16>
      %105 = vector.shape_cast %104 : vector<1x8x128xbf16> to vector<8x128xbf16>
      %106 = vector.shape_cast %103 : vector<8x128xbf16> to vector<1x8x128xbf16>
      tpu.vector_store %arg8[%c0_68, %c0_69, %c0_70], %106 {strides = array<i32>} : memref<1x8x128xbf16, #tpu.memory_space<vmem>>, vector<1x8x128xbf16>,
    } else {
    }
    return
  }
  func.func @transform_0(%arg0: i32, %arg1: i32, %arg2: i32, %arg3: i32) -> (i32, i32, i32) {
    %c0_i32 = arith.constant 0 : i32
    return %arg0, %arg2, %arg1 : i32, i32, i32
  }
  func.func @transform_1(%arg0: i32, %arg1: i32, %arg2: i32, %arg3: i32) -> (i32, i32, i32) {
    %c1_i32 = arith.constant 1 : i32
    %0 = arith.addi %c1_i32, %arg1 : i32
    %c0_i32 = arith.constant 0 : i32
    return %arg0, %arg3, %0 : i32, i32, i32
  }
  func.func @transform_2(%arg0: i32, %arg1: i32, %arg2: i32, %arg3: i32) -> (i32, i32, i32) {
    %c2_i32 = arith.constant 2 : i32
    %0 = arith.addi %c2_i32, %arg1 : i32
    %c0_i32 = arith.constant 0 : i32
    return %arg0, %arg3, %0 : i32, i32, i32
  }
  func.func @transform_3(%arg0: i32, %arg1: i32, %arg2: i32, %arg3: i32) -> (i32, i32, i32) {
    %c0_i32 = arith.constant 0 : i32
    return %arg0, %arg2, %arg3 : i32, i32, i32
  }
  func.func @transform_4(%arg0: i32, %arg1: i32, %arg2: i32, %arg3: i32) -> (i32, i32, i32) {
    %c0_i32 = arith.constant 0 : i32
    return %arg0, %arg2, %arg1 : i32, i32, i32
  }
}

module attributes {stable_mosaic.version = 11 : i64} {
  func.func @_ffn_kernel(%arg0: i32, %arg1: i32, %arg2: memref<8x128xbf16, #tpu.memory_space<vmem>>, %arg3: memref<128x512xbf16, #tpu.memory_space<vmem>>, %arg4: memref<1x512xf32, #tpu.memory_space<vmem>>, %arg5: memref<512x128xbf16, #tpu.memory_space<vmem>>, %arg6: memref<1x128xf32, #tpu.memory_space<vmem>>, %arg7: memref<1x128xf32, #tpu.memory_space<vmem>>, %arg8: memref<1x128xf32, #tpu.memory_space<vmem>>, %arg9: memref<8x128xbf16, #tpu.memory_space<vmem>>, %arg10: memref<8x128xf32, #tpu.memory_space<vmem>>) attributes {dimension_semantics = [#tpu.dimension_semantics<parallel>, #tpu.dimension_semantics<arbitrary>], iteration_bounds = array<i64: 2, 1>, scalar_prefetch = 0 : i64, scratch_operands = 1 : i64, tpu.core_type = #tpu.core_type<tc>, window_params = [{transform_indices = @transform_0, window_bounds = array<i64: 8, 128>}, {transform_indices = @transform_1, window_bounds = array<i64: 128, 512>}, {transform_indices = @transform_2, window_bounds = array<i64: 1, 512>}, {transform_indices = @transform_3, window_bounds = array<i64: 512, 128>}, {pipeline_mode = #tpu.pipeline_mode<synchronous>, transform_indices = @transform_4, window_bounds = array<i64: 1, 128>}, {pipeline_mode = #tpu.pipeline_mode<synchronous>, transform_indices = @transform_5, window_bounds = array<i64: 1, 128>}, {pipeline_mode = #tpu.pipeline_mode<synchronous>, transform_indices = @transform_6, window_bounds = array<i64: 1, 128>}, {transform_indices = @transform_7, window_bounds = array<i64: 8, 128>}]} {
    %c0_i32 = arith.constant 0 : i32
    %0 = arith.cmpi eq, %arg1, %c0_i32 : i32
    %1 = arith.extui %0 : i1 to i32
    %c0_i32_0 = arith.constant 0 : i32
    %2 = arith.cmpi ne, %1, %c0_i32_0 : i32
    scf.if %2 {
      %cst_19 = arith.constant 0.000000e+00 : f32
      %31 = vector.broadcast %cst_19 : f32 to vector<8x128xf32>
      %c0_20 = arith.constant 0 : index
      %c0_21 = arith.constant 0 : index
      %32 = vector.load %arg10[%c0_20, %c0_21] : memref<8x128xf32, #tpu.memory_space<vmem>>, vector<8x128xf32>
      tpu.vector_store %arg10[%c0_20, %c0_21], %31 {strides = array<i32>} : memref<8x128xf32, #tpu.memory_space<vmem>>, vector<8x128xf32>,
    } else {
    }
    %c0 = arith.constant 0 : index
    %c0_1 = arith.constant 0 : index
    %3 = vector.load %arg2[%c0, %c0_1] : memref<8x128xbf16, #tpu.memory_space<vmem>>, vector<8x128xbf16>
    %c0_2 = arith.constant 0 : index
    %c0_3 = arith.constant 0 : index
    %4 = vector.load %arg3[%c0_2, %c0_3] : memref<128x512xbf16, #tpu.memory_space<vmem>>, vector<128x512xbf16>
    %cst = arith.constant dense<0.000000e+00> : vector<8x512xf32>
    %5 = tpu.matmul %3, %4, %cst {dimension_numbers = #tpu.dot_dimension_numbers<[1], [0], [0], [1], [0, 0, 1, 1], [], []>} : vector<8x128xbf16>, vector<128x512xbf16>, vector<8x512xf32> -> vector<8x512xf32>
    %c0_4 = arith.constant 0 : index
    %c0_5 = arith.constant 0 : index
    %6 = vector.load %arg4[%c0_4, %c0_5] : memref<1x512xf32, #tpu.memory_space<vmem>>, vector<1x512xf32>
    %7 = vector.broadcast %6 : vector<1x512xf32> to vector<8x512xf32>
    %8 = arith.addf %5, %7 : vector<8x512xf32>
    %cst_6 = arith.constant 5.000000e-01 : f32
    %9 = vector.broadcast %cst_6 : f32 to vector<8x512xf32>
    %10 = arith.mulf %9, %8 : vector<8x512xf32>
    %cst_7 = arith.constant 4.471500e-02 : f32
    %11 = vector.broadcast %cst_7 : f32 to vector<8x512xf32>
    %12 = arith.mulf %11, %8 : vector<8x512xf32>
    %13 = arith.mulf %12, %8 : vector<8x512xf32>
    %14 = arith.mulf %13, %8 : vector<8x512xf32>
    %15 = arith.addf %8, %14 : vector<8x512xf32>
    %cst_8 = arith.constant 0.797884583 : f32
    %16 = vector.broadcast %cst_8 : f32 to vector<8x512xf32>
    %17 = arith.mulf %16, %15 : vector<8x512xf32>
    %18 = math.tanh %17 : vector<8x512xf32>
    %cst_9 = arith.constant 1.000000e+00 : f32
    %19 = vector.broadcast %cst_9 : f32 to vector<8x512xf32>
    %20 = arith.addf %19, %18 : vector<8x512xf32>
    %21 = arith.mulf %10, %20 : vector<8x512xf32>
    %c0_10 = arith.constant 0 : index
    %c0_11 = arith.constant 0 : index
    %22 = vector.load %arg10[%c0_10, %c0_11] : memref<8x128xf32, #tpu.memory_space<vmem>>, vector<8x128xf32>
    %23 = arith.truncf %21 : vector<8x512xf32> to vector<8x512xbf16>
    %c0_12 = arith.constant 0 : index
    %c0_13 = arith.constant 0 : index
    %24 = vector.load %arg5[%c0_12, %c0_13] : memref<512x128xbf16, #tpu.memory_space<vmem>>, vector<512x128xbf16>
    %cst_14 = arith.constant dense<0.000000e+00> : vector<8x128xf32>
    %25 = tpu.matmul %23, %24, %cst_14 {dimension_numbers = #tpu.dot_dimension_numbers<[1], [0], [0], [1], [0, 0, 1, 1], [], []>} : vector<8x512xbf16>, vector<512x128xbf16>, vector<8x128xf32> -> vector<8x128xf32>
    %26 = arith.addf %22, %25 : vector<8x128xf32>
    %c0_15 = arith.constant 0 : index
    %c0_16 = arith.constant 0 : index
    %27 = vector.load %arg10[%c0_15, %c0_16] : memref<8x128xf32, #tpu.memory_space<vmem>>, vector<8x128xf32>
    tpu.vector_store %arg10[%c0_15, %c0_16], %26 {strides = array<i32>} : memref<8x128xf32, #tpu.memory_space<vmem>>, vector<8x128xf32>,
    %c0_i32_17 = arith.constant 0 : i32
    %28 = arith.cmpi eq, %arg1, %c0_i32_17 : i32
    %29 = arith.extui %28 : i1 to i32
    %c0_i32_18 = arith.constant 0 : i32
    %30 = arith.cmpi ne, %29, %c0_i32_18 : i32
    scf.if %30 {
      %c0_19 = arith.constant 0 : index
      %c0_20 = arith.constant 0 : index
      %31 = vector.load %arg10[%c0_19, %c0_20] : memref<8x128xf32, #tpu.memory_space<vmem>>, vector<8x128xf32>
      %c0_21 = arith.constant 0 : index
      %c0_22 = arith.constant 0 : index
      %32 = vector.load %arg6[%c0_21, %c0_22] : memref<1x128xf32, #tpu.memory_space<vmem>>, vector<1x128xf32>
      %33 = vector.broadcast %32 : vector<1x128xf32> to vector<8x128xf32>
      %34 = arith.addf %31, %33 : vector<8x128xf32>
      %c0_23 = arith.constant 0 : index
      %c0_24 = arith.constant 0 : index
      %35 = vector.load %arg2[%c0_23, %c0_24] : memref<8x128xbf16, #tpu.memory_space<vmem>>, vector<8x128xbf16>
      %36 = arith.extf %35 : vector<8x128xbf16> to vector<8x128xf32>
      %37 = arith.addf %34, %36 : vector<8x128xf32>
      %cst_25 = arith.constant dense<0.000000e+00> : vector<8xf32>
      %38 = vector.multi_reduction <add>, %37, %cst_25 [1] : vector<8x128xf32> to vector<8xf32>
      %39 = vector.shape_cast %38 : vector<8xf32> to vector<8x1xf32>
      %cst_26 = arith.constant 1.280000e+02 : f32
      %40 = vector.broadcast %cst_26 : f32 to vector<8x1xf32>
      %41 = arith.divf %39, %40 : vector<8x1xf32>
      %42 = vector.broadcast %41 : vector<8x1xf32> to vector<8x128xf32>
      %43 = arith.subf %37, %42 : vector<8x128xf32>
      %44 = arith.mulf %43, %43 : vector<8x128xf32>
      %cst_27 = arith.constant dense<0.000000e+00> : vector<8xf32>
      %45 = vector.multi_reduction <add>, %44, %cst_27 [1] : vector<8x128xf32> to vector<8xf32>
      %46 = vector.shape_cast %45 : vector<8xf32> to vector<8x1xf32>
      %cst_28 = arith.constant 1.280000e+02 : f32
      %47 = vector.broadcast %cst_28 : f32 to vector<8x1xf32>
      %48 = arith.divf %46, %47 : vector<8x1xf32>
      %cst_29 = arith.constant 9.99999997E-7 : f32
      %49 = vector.broadcast %cst_29 : f32 to vector<8x1xf32>
      %50 = arith.addf %48, %49 : vector<8x1xf32>
      %51 = math.rsqrt %50 : vector<8x1xf32>
      %52 = vector.broadcast %51 : vector<8x1xf32> to vector<8x128xf32>
      %53 = arith.mulf %43, %52 : vector<8x128xf32>
      %c0_30 = arith.constant 0 : index
      %c0_31 = arith.constant 0 : index
      %54 = vector.load %arg7[%c0_30, %c0_31] : memref<1x128xf32, #tpu.memory_space<vmem>>, vector<1x128xf32>
      %55 = vector.broadcast %54 : vector<1x128xf32> to vector<8x128xf32>
      %56 = arith.mulf %53, %55 : vector<8x128xf32>
      %c0_32 = arith.constant 0 : index
      %c0_33 = arith.constant 0 : index
      %57 = vector.load %arg8[%c0_32, %c0_33] : memref<1x128xf32, #tpu.memory_space<vmem>>, vector<1x128xf32>
      %58 = vector.broadcast %57 : vector<1x128xf32> to vector<8x128xf32>
      %59 = arith.addf %56, %58 : vector<8x128xf32>
      %60 = arith.truncf %59 : vector<8x128xf32> to vector<8x128xbf16>
      %c0_34 = arith.constant 0 : index
      %c0_35 = arith.constant 0 : index
      %61 = vector.load %arg9[%c0_34, %c0_35] : memref<8x128xbf16, #tpu.memory_space<vmem>>, vector<8x128xbf16>
      tpu.vector_store %arg9[%c0_34, %c0_35], %60 {strides = array<i32>} : memref<8x128xbf16, #tpu.memory_space<vmem>>, vector<8x128xbf16>,
    } else {
    }
    return
  }
  func.func @transform_0(%arg0: i32, %arg1: i32) -> (i32, i32) {
    %c0_i32 = arith.constant 0 : i32
    %c0_i32_0 = arith.constant 0 : i32
    return %arg0, %c0_i32 : i32, i32
  }
  func.func @transform_1(%arg0: i32, %arg1: i32) -> (i32, i32) {
    %c0_i32 = arith.constant 0 : i32
    %c0_i32_0 = arith.constant 0 : i32
    return %c0_i32, %arg1 : i32, i32
  }
  func.func @transform_2(%arg0: i32, %arg1: i32) -> (i32, i32) {
    %c0_i32 = arith.constant 0 : i32
    %c0_i32_0 = arith.constant 0 : i32
    return %c0_i32, %arg1 : i32, i32
  }
  func.func @transform_3(%arg0: i32, %arg1: i32) -> (i32, i32) {
    %c0_i32 = arith.constant 0 : i32
    %c0_i32_0 = arith.constant 0 : i32
    return %arg1, %c0_i32 : i32, i32
  }
  func.func @transform_4(%arg0: i32, %arg1: i32) -> (i32, i32) {
    %c0_i32 = arith.constant 0 : i32
    %c0_i32_0 = arith.constant 0 : i32
    %c0_i32_1 = arith.constant 0 : i32
    return %c0_i32, %c0_i32_0 : i32, i32
  }
  func.func @transform_5(%arg0: i32, %arg1: i32) -> (i32, i32) {
    %c0_i32 = arith.constant 0 : i32
    %c0_i32_0 = arith.constant 0 : i32
    %c0_i32_1 = arith.constant 0 : i32
    return %c0_i32, %c0_i32_0 : i32, i32
  }
  func.func @transform_6(%arg0: i32, %arg1: i32) -> (i32, i32) {
    %c0_i32 = arith.constant 0 : i32
    %c0_i32_0 = arith.constant 0 : i32
    %c0_i32_1 = arith.constant 0 : i32
    return %c0_i32, %c0_i32_0 : i32, i32
  }
  func.func @transform_7(%arg0: i32, %arg1: i32) -> (i32, i32) {
    %c0_i32 = arith.constant 0 : i32
    %c0_i32_0 = arith.constant 0 : i32
    return %arg0, %c0_i32 : i32, i32
  }
}

module attributes {stable_mosaic.version = 11 : i64} {
  func.func @_dense_add_ln_kernel(%arg0: i32, %arg1: i32, %arg2: memref<8x128xbf16, #tpu.memory_space<vmem>>, %arg3: memref<128x128xbf16, #tpu.memory_space<vmem>>, %arg4: memref<1x128xf32, #tpu.memory_space<vmem>>, %arg5: memref<8x128xbf16, #tpu.memory_space<vmem>>, %arg6: memref<1x128xf32, #tpu.memory_space<vmem>>, %arg7: memref<1x128xf32, #tpu.memory_space<vmem>>, %arg8: memref<8x128xbf16, #tpu.memory_space<vmem>>, %arg9: memref<8x128xf32, #tpu.memory_space<vmem>>) attributes {dimension_semantics = [#tpu.dimension_semantics<parallel>, #tpu.dimension_semantics<arbitrary>], iteration_bounds = array<i64: 2, 1>, scalar_prefetch = 0 : i64, scratch_operands = 1 : i64, tpu.core_type = #tpu.core_type<tc>, window_params = [{transform_indices = @transform_0, window_bounds = array<i64: 8, 128>}, {transform_indices = @transform_1, window_bounds = array<i64: 128, 128>}, {pipeline_mode = #tpu.pipeline_mode<synchronous>, transform_indices = @transform_2, window_bounds = array<i64: 1, 128>}, {transform_indices = @transform_3, window_bounds = array<i64: 8, 128>}, {pipeline_mode = #tpu.pipeline_mode<synchronous>, transform_indices = @transform_4, window_bounds = array<i64: 1, 128>}, {pipeline_mode = #tpu.pipeline_mode<synchronous>, transform_indices = @transform_5, window_bounds = array<i64: 1, 128>}, {transform_indices = @transform_6, window_bounds = array<i64: 8, 128>}]} {
    %c0_i32 = arith.constant 0 : i32
    %0 = arith.cmpi eq, %arg1, %c0_i32 : i32
    %1 = arith.extui %0 : i1 to i32
    %c0_i32_0 = arith.constant 0 : i32
    %2 = arith.cmpi ne, %1, %c0_i32_0 : i32
    scf.if %2 {
      %cst_10 = arith.constant 0.000000e+00 : f32
      %12 = vector.broadcast %cst_10 : f32 to vector<8x128xf32>
      %c0_11 = arith.constant 0 : index
      %c0_12 = arith.constant 0 : index
      %13 = vector.load %arg9[%c0_11, %c0_12] : memref<8x128xf32, #tpu.memory_space<vmem>>, vector<8x128xf32>
      tpu.vector_store %arg9[%c0_11, %c0_12], %12 {strides = array<i32>} : memref<8x128xf32, #tpu.memory_space<vmem>>, vector<8x128xf32>,
    } else {
    }
    %c0 = arith.constant 0 : index
    %c0_1 = arith.constant 0 : index
    %3 = vector.load %arg9[%c0, %c0_1] : memref<8x128xf32, #tpu.memory_space<vmem>>, vector<8x128xf32>
    %c0_2 = arith.constant 0 : index
    %c0_3 = arith.constant 0 : index
    %4 = vector.load %arg2[%c0_2, %c0_3] : memref<8x128xbf16, #tpu.memory_space<vmem>>, vector<8x128xbf16>
    %c0_4 = arith.constant 0 : index
    %c0_5 = arith.constant 0 : index
    %5 = vector.load %arg3[%c0_4, %c0_5] : memref<128x128xbf16, #tpu.memory_space<vmem>>, vector<128x128xbf16>
    %cst = arith.constant dense<0.000000e+00> : vector<8x128xf32>
    %6 = tpu.matmul %4, %5, %cst {dimension_numbers = #tpu.dot_dimension_numbers<[1], [0], [0], [1], [0, 0, 1, 1], [], []>} : vector<8x128xbf16>, vector<128x128xbf16>, vector<8x128xf32> -> vector<8x128xf32>
    %7 = arith.addf %3, %6 : vector<8x128xf32>
    %c0_6 = arith.constant 0 : index
    %c0_7 = arith.constant 0 : index
    %8 = vector.load %arg9[%c0_6, %c0_7] : memref<8x128xf32, #tpu.memory_space<vmem>>, vector<8x128xf32>
    tpu.vector_store %arg9[%c0_6, %c0_7], %7 {strides = array<i32>} : memref<8x128xf32, #tpu.memory_space<vmem>>, vector<8x128xf32>,
    %c0_i32_8 = arith.constant 0 : i32
    %9 = arith.cmpi eq, %arg1, %c0_i32_8 : i32
    %10 = arith.extui %9 : i1 to i32
    %c0_i32_9 = arith.constant 0 : i32
    %11 = arith.cmpi ne, %10, %c0_i32_9 : i32
    scf.if %11 {
      %c0_10 = arith.constant 0 : index
      %c0_11 = arith.constant 0 : index
      %12 = vector.load %arg9[%c0_10, %c0_11] : memref<8x128xf32, #tpu.memory_space<vmem>>, vector<8x128xf32>
      %c0_12 = arith.constant 0 : index
      %c0_13 = arith.constant 0 : index
      %13 = vector.load %arg4[%c0_12, %c0_13] : memref<1x128xf32, #tpu.memory_space<vmem>>, vector<1x128xf32>
      %14 = vector.broadcast %13 : vector<1x128xf32> to vector<8x128xf32>
      %15 = arith.addf %12, %14 : vector<8x128xf32>
      %c0_14 = arith.constant 0 : index
      %c0_15 = arith.constant 0 : index
      %16 = vector.load %arg5[%c0_14, %c0_15] : memref<8x128xbf16, #tpu.memory_space<vmem>>, vector<8x128xbf16>
      %17 = arith.extf %16 : vector<8x128xbf16> to vector<8x128xf32>
      %18 = arith.addf %15, %17 : vector<8x128xf32>
      %cst_16 = arith.constant dense<0.000000e+00> : vector<8xf32>
      %19 = vector.multi_reduction <add>, %18, %cst_16 [1] : vector<8x128xf32> to vector<8xf32>
      %20 = vector.shape_cast %19 : vector<8xf32> to vector<8x1xf32>
      %cst_17 = arith.constant 1.280000e+02 : f32
      %21 = vector.broadcast %cst_17 : f32 to vector<8x1xf32>
      %22 = arith.divf %20, %21 : vector<8x1xf32>
      %23 = vector.broadcast %22 : vector<8x1xf32> to vector<8x128xf32>
      %24 = arith.subf %18, %23 : vector<8x128xf32>
      %25 = arith.mulf %24, %24 : vector<8x128xf32>
      %cst_18 = arith.constant dense<0.000000e+00> : vector<8xf32>
      %26 = vector.multi_reduction <add>, %25, %cst_18 [1] : vector<8x128xf32> to vector<8xf32>
      %27 = vector.shape_cast %26 : vector<8xf32> to vector<8x1xf32>
      %cst_19 = arith.constant 1.280000e+02 : f32
      %28 = vector.broadcast %cst_19 : f32 to vector<8x1xf32>
      %29 = arith.divf %27, %28 : vector<8x1xf32>
      %cst_20 = arith.constant 9.99999997E-7 : f32
      %30 = vector.broadcast %cst_20 : f32 to vector<8x1xf32>
      %31 = arith.addf %29, %30 : vector<8x1xf32>
      %32 = math.rsqrt %31 : vector<8x1xf32>
      %33 = vector.broadcast %32 : vector<8x1xf32> to vector<8x128xf32>
      %34 = arith.mulf %24, %33 : vector<8x128xf32>
      %c0_21 = arith.constant 0 : index
      %c0_22 = arith.constant 0 : index
      %35 = vector.load %arg6[%c0_21, %c0_22] : memref<1x128xf32, #tpu.memory_space<vmem>>, vector<1x128xf32>
      %36 = vector.broadcast %35 : vector<1x128xf32> to vector<8x128xf32>
      %37 = arith.mulf %34, %36 : vector<8x128xf32>
      %c0_23 = arith.constant 0 : index
      %c0_24 = arith.constant 0 : index
      %38 = vector.load %arg7[%c0_23, %c0_24] : memref<1x128xf32, #tpu.memory_space<vmem>>, vector<1x128xf32>
      %39 = vector.broadcast %38 : vector<1x128xf32> to vector<8x128xf32>
      %40 = arith.addf %37, %39 : vector<8x128xf32>
      %41 = arith.truncf %40 : vector<8x128xf32> to vector<8x128xbf16>
      %c0_25 = arith.constant 0 : index
      %c0_26 = arith.constant 0 : index
      %42 = vector.load %arg8[%c0_25, %c0_26] : memref<8x128xbf16, #tpu.memory_space<vmem>>, vector<8x128xbf16>
      tpu.vector_store %arg8[%c0_25, %c0_26], %41 {strides = array<i32>} : memref<8x128xbf16, #tpu.memory_space<vmem>>, vector<8x128xbf16>,
    } else {
    }
    return
  }
  func.func @transform_0(%arg0: i32, %arg1: i32) -> (i32, i32) {
    %c0_i32 = arith.constant 0 : i32
    return %arg0, %arg1 : i32, i32
  }
  func.func @transform_1(%arg0: i32, %arg1: i32) -> (i32, i32) {
    %c0_i32 = arith.constant 0 : i32
    %c0_i32_0 = arith.constant 0 : i32
    return %arg1, %c0_i32 : i32, i32
  }
  func.func @transform_2(%arg0: i32, %arg1: i32) -> (i32, i32) {
    %c0_i32 = arith.constant 0 : i32
    %c0_i32_0 = arith.constant 0 : i32
    %c0_i32_1 = arith.constant 0 : i32
    return %c0_i32, %c0_i32_0 : i32, i32
  }
  func.func @transform_3(%arg0: i32, %arg1: i32) -> (i32, i32) {
    %c0_i32 = arith.constant 0 : i32
    %c0_i32_0 = arith.constant 0 : i32
    return %arg0, %c0_i32 : i32, i32
  }
  func.func @transform_4(%arg0: i32, %arg1: i32) -> (i32, i32) {
    %c0_i32 = arith.constant 0 : i32
    %c0_i32_0 = arith.constant 0 : i32
    %c0_i32_1 = arith.constant 0 : i32
    return %c0_i32, %c0_i32_0 : i32, i32
  }
  func.func @transform_5(%arg0: i32, %arg1: i32) -> (i32, i32) {
    %c0_i32 = arith.constant 0 : i32
    %c0_i32_0 = arith.constant 0 : i32
    %c0_i32_1 = arith.constant 0 : i32
    return %c0_i32, %c0_i32_0 : i32, i32
  }
  func.func @transform_6(%arg0: i32, %arg1: i32) -> (i32, i32) {
    %c0_i32 = arith.constant 0 : i32
    %c0_i32_0 = arith.constant 0 : i32
    return %arg0, %c0_i32 : i32, i32
  }
}

module attributes {stable_mosaic.version = 11 : i64} {
  func.func @_matmul_bias_kernel(%arg0: i32, %arg1: i32, %arg2: memref<8x128xbf16, #tpu.memory_space<vmem>>, %arg3: memref<128x384xbf16, #tpu.memory_space<vmem>>, %arg4: memref<1x384xf32, #tpu.memory_space<vmem>>, %arg5: memref<8x384xbf16, #tpu.memory_space<vmem>>) attributes {dimension_semantics = [#tpu.dimension_semantics<parallel>, #tpu.dimension_semantics<parallel>], iteration_bounds = array<i64: 2, 1>, scalar_prefetch = 0 : i64, scratch_operands = 0 : i64, tpu.core_type = #tpu.core_type<tc>, window_params = [{transform_indices = @transform_0, window_bounds = array<i64: 8, 128>}, {transform_indices = @transform_1, window_bounds = array<i64: 128, 384>}, {transform_indices = @transform_2, window_bounds = array<i64: 1, 384>}, {transform_indices = @transform_3, window_bounds = array<i64: 8, 384>}]} {
    %c0 = arith.constant 0 : index
    %c0_0 = arith.constant 0 : index
    %0 = vector.load %arg2[%c0, %c0_0] : memref<8x128xbf16, #tpu.memory_space<vmem>>, vector<8x128xbf16>
    %c0_1 = arith.constant 0 : index
    %c0_2 = arith.constant 0 : index
    %1 = vector.load %arg3[%c0_1, %c0_2] : memref<128x384xbf16, #tpu.memory_space<vmem>>, vector<128x384xbf16>
    %cst = arith.constant dense<0.000000e+00> : vector<8x384xf32>
    %2 = tpu.matmul %0, %1, %cst {dimension_numbers = #tpu.dot_dimension_numbers<[1], [0], [0], [1], [0, 0, 1, 1], [], []>} : vector<8x128xbf16>, vector<128x384xbf16>, vector<8x384xf32> -> vector<8x384xf32>
    %c0_3 = arith.constant 0 : index
    %c0_4 = arith.constant 0 : index
    %3 = vector.load %arg4[%c0_3, %c0_4] : memref<1x384xf32, #tpu.memory_space<vmem>>, vector<1x384xf32>
    %4 = vector.broadcast %3 : vector<1x384xf32> to vector<8x384xf32>
    %5 = arith.addf %2, %4 : vector<8x384xf32>
    %6 = arith.truncf %5 : vector<8x384xf32> to vector<8x384xbf16>
    %c0_5 = arith.constant 0 : index
    %c0_6 = arith.constant 0 : index
    %7 = vector.load %arg5[%c0_5, %c0_6] : memref<8x384xbf16, #tpu.memory_space<vmem>>, vector<8x384xbf16>
    tpu.vector_store %arg5[%c0_5, %c0_6], %6 {strides = array<i32>} : memref<8x384xbf16, #tpu.memory_space<vmem>>, vector<8x384xbf16>,
    return
  }
  func.func @transform_0(%arg0: i32, %arg1: i32) -> (i32, i32) {
    %c0_i32 = arith.constant 0 : i32
    %c0_i32_0 = arith.constant 0 : i32
    return %arg0, %c0_i32 : i32, i32
  }
  func.func @transform_1(%arg0: i32, %arg1: i32) -> (i32, i32) {
    %c0_i32 = arith.constant 0 : i32
    %c0_i32_0 = arith.constant 0 : i32
    return %c0_i32, %arg1 : i32, i32
  }
  func.func @transform_2(%arg0: i32, %arg1: i32) -> (i32, i32) {
    %c0_i32 = arith.constant 0 : i32
    %c0_i32_0 = arith.constant 0 : i32
    return %c0_i32, %arg1 : i32, i32
  }
  func.func @transform_3(%arg0: i32, %arg1: i32) -> (i32, i32) {
    %c0_i32 = arith.constant 0 : i32
    return %arg0, %arg1 : i32, i32
  }
}

module attributes {stable_mosaic.version = 11 : i64} {
  func.func @_ffn_kernel(%arg0: i32, %arg1: i32, %arg2: memref<8x128xbf16, #tpu.memory_space<vmem>>, %arg3: memref<128x512xbf16, #tpu.memory_space<vmem>>, %arg4: memref<1x512xf32, #tpu.memory_space<vmem>>, %arg5: memref<512x128xbf16, #tpu.memory_space<vmem>>, %arg6: memref<1x128xf32, #tpu.memory_space<vmem>>, %arg7: memref<1x128xf32, #tpu.memory_space<vmem>>, %arg8: memref<1x128xf32, #tpu.memory_space<vmem>>, %arg9: memref<8x128xbf16, #tpu.memory_space<vmem>>, %arg10: memref<8x128xf32, #tpu.memory_space<vmem>>) attributes {dimension_semantics = [#tpu.dimension_semantics<parallel>, #tpu.dimension_semantics<arbitrary>], iteration_bounds = array<i64: 2, 1>, scalar_prefetch = 0 : i64, scratch_operands = 1 : i64, tpu.core_type = #tpu.core_type<tc>, window_params = [{transform_indices = @transform_0, window_bounds = array<i64: 8, 128>}, {transform_indices = @transform_1, window_bounds = array<i64: 128, 512>}, {transform_indices = @transform_2, window_bounds = array<i64: 1, 512>}, {transform_indices = @transform_3, window_bounds = array<i64: 512, 128>}, {pipeline_mode = #tpu.pipeline_mode<synchronous>, transform_indices = @transform_4, window_bounds = array<i64: 1, 128>}, {pipeline_mode = #tpu.pipeline_mode<synchronous>, transform_indices = @transform_5, window_bounds = array<i64: 1, 128>}, {pipeline_mode = #tpu.pipeline_mode<synchronous>, transform_indices = @transform_6, window_bounds = array<i64: 1, 128>}, {transform_indices = @transform_7, window_bounds = array<i64: 8, 128>}]} {
    %c0_i32 = arith.constant 0 : i32
    %0 = arith.cmpi eq, %arg1, %c0_i32 : i32
    %1 = arith.extui %0 : i1 to i32
    %c0_i32_0 = arith.constant 0 : i32
    %2 = arith.cmpi ne, %1, %c0_i32_0 : i32
    scf.if %2 {
      %cst_19 = arith.constant 0.000000e+00 : f32
      %31 = vector.broadcast %cst_19 : f32 to vector<8x128xf32>
      %c0_20 = arith.constant 0 : index
      %c0_21 = arith.constant 0 : index
      %32 = vector.load %arg10[%c0_20, %c0_21] : memref<8x128xf32, #tpu.memory_space<vmem>>, vector<8x128xf32>
      tpu.vector_store %arg10[%c0_20, %c0_21], %31 {strides = array<i32>} : memref<8x128xf32, #tpu.memory_space<vmem>>, vector<8x128xf32>,
    } else {
    }
    %c0 = arith.constant 0 : index
    %c0_1 = arith.constant 0 : index
    %3 = vector.load %arg2[%c0, %c0_1] : memref<8x128xbf16, #tpu.memory_space<vmem>>, vector<8x128xbf16>
    %c0_2 = arith.constant 0 : index
    %c0_3 = arith.constant 0 : index
    %4 = vector.load %arg3[%c0_2, %c0_3] : memref<128x512xbf16, #tpu.memory_space<vmem>>, vector<128x512xbf16>
    %cst = arith.constant dense<0.000000e+00> : vector<8x512xf32>
    %5 = tpu.matmul %3, %4, %cst {dimension_numbers = #tpu.dot_dimension_numbers<[1], [0], [0], [1], [0, 0, 1, 1], [], []>} : vector<8x128xbf16>, vector<128x512xbf16>, vector<8x512xf32> -> vector<8x512xf32>
    %c0_4 = arith.constant 0 : index
    %c0_5 = arith.constant 0 : index
    %6 = vector.load %arg4[%c0_4, %c0_5] : memref<1x512xf32, #tpu.memory_space<vmem>>, vector<1x512xf32>
    %7 = vector.broadcast %6 : vector<1x512xf32> to vector<8x512xf32>
    %8 = arith.addf %5, %7 : vector<8x512xf32>
    %cst_6 = arith.constant 5.000000e-01 : f32
    %9 = vector.broadcast %cst_6 : f32 to vector<8x512xf32>
    %10 = arith.mulf %9, %8 : vector<8x512xf32>
    %cst_7 = arith.constant 4.471500e-02 : f32
    %11 = vector.broadcast %cst_7 : f32 to vector<8x512xf32>
    %12 = arith.mulf %11, %8 : vector<8x512xf32>
    %13 = arith.mulf %12, %8 : vector<8x512xf32>
    %14 = arith.mulf %13, %8 : vector<8x512xf32>
    %15 = arith.addf %8, %14 : vector<8x512xf32>
    %cst_8 = arith.constant 0.797884583 : f32
    %16 = vector.broadcast %cst_8 : f32 to vector<8x512xf32>
    %17 = arith.mulf %16, %15 : vector<8x512xf32>
    %18 = math.tanh %17 : vector<8x512xf32>
    %cst_9 = arith.constant 1.000000e+00 : f32
    %19 = vector.broadcast %cst_9 : f32 to vector<8x512xf32>
    %20 = arith.addf %19, %18 : vector<8x512xf32>
    %21 = arith.mulf %10, %20 : vector<8x512xf32>
    %c0_10 = arith.constant 0 : index
    %c0_11 = arith.constant 0 : index
    %22 = vector.load %arg10[%c0_10, %c0_11] : memref<8x128xf32, #tpu.memory_space<vmem>>, vector<8x128xf32>
    %23 = arith.truncf %21 : vector<8x512xf32> to vector<8x512xbf16>
    %c0_12 = arith.constant 0 : index
    %c0_13 = arith.constant 0 : index
    %24 = vector.load %arg5[%c0_12, %c0_13] : memref<512x128xbf16, #tpu.memory_space<vmem>>, vector<512x128xbf16>
    %cst_14 = arith.constant dense<0.000000e+00> : vector<8x128xf32>
    %25 = tpu.matmul %23, %24, %cst_14 {dimension_numbers = #tpu.dot_dimension_numbers<[1], [0], [0], [1], [0, 0, 1, 1], [], []>} : vector<8x512xbf16>, vector<512x128xbf16>, vector<8x128xf32> -> vector<8x128xf32>
    %26 = arith.addf %22, %25 : vector<8x128xf32>
    %c0_15 = arith.constant 0 : index
    %c0_16 = arith.constant 0 : index
    %27 = vector.load %arg10[%c0_15, %c0_16] : memref<8x128xf32, #tpu.memory_space<vmem>>, vector<8x128xf32>
    tpu.vector_store %arg10[%c0_15, %c0_16], %26 {strides = array<i32>} : memref<8x128xf32, #tpu.memory_space<vmem>>, vector<8x128xf32>,
    %c0_i32_17 = arith.constant 0 : i32
    %28 = arith.cmpi eq, %arg1, %c0_i32_17 : i32
    %29 = arith.extui %28 : i1 to i32
    %c0_i32_18 = arith.constant 0 : i32
    %30 = arith.cmpi ne, %29, %c0_i32_18 : i32
    scf.if %30 {
      %c0_19 = arith.constant 0 : index
      %c0_20 = arith.constant 0 : index
      %31 = vector.load %arg10[%c0_19, %c0_20] : memref<8x128xf32, #tpu.memory_space<vmem>>, vector<8x128xf32>
      %c0_21 = arith.constant 0 : index
      %c0_22 = arith.constant 0 : index
      %32 = vector.load %arg6[%c0_21, %c0_22] : memref<1x128xf32, #tpu.memory_space<vmem>>, vector<1x128xf32>
      %33 = vector.broadcast %32 : vector<1x128xf32> to vector<8x128xf32>
      %34 = arith.addf %31, %33 : vector<8x128xf32>
      %c0_23 = arith.constant 0 : index
      %c0_24 = arith.constant 0 : index
      %35 = vector.load %arg2[%c0_23, %c0_24] : memref<8x128xbf16, #tpu.memory_space<vmem>>, vector<8x128xbf16>
      %36 = arith.extf %35 : vector<8x128xbf16> to vector<8x128xf32>
      %37 = arith.addf %34, %36 : vector<8x128xf32>
      %cst_25 = arith.constant dense<0.000000e+00> : vector<8xf32>
      %38 = vector.multi_reduction <add>, %37, %cst_25 [1] : vector<8x128xf32> to vector<8xf32>
      %39 = vector.shape_cast %38 : vector<8xf32> to vector<8x1xf32>
      %cst_26 = arith.constant 1.280000e+02 : f32
      %40 = vector.broadcast %cst_26 : f32 to vector<8x1xf32>
      %41 = arith.divf %39, %40 : vector<8x1xf32>
      %42 = vector.broadcast %41 : vector<8x1xf32> to vector<8x128xf32>
      %43 = arith.subf %37, %42 : vector<8x128xf32>
      %44 = arith.mulf %43, %43 : vector<8x128xf32>
      %cst_27 = arith.constant dense<0.000000e+00> : vector<8xf32>
      %45 = vector.multi_reduction <add>, %44, %cst_27 [1] : vector<8x128xf32> to vector<8xf32>
      %46 = vector.shape_cast %45 : vector<8xf32> to vector<8x1xf32>
      %cst_28 = arith.constant 1.280000e+02 : f32
      %47 = vector.broadcast %cst_28 : f32 to vector<8x1xf32>
      %48 = arith.divf %46, %47 : vector<8x1xf32>
      %cst_29 = arith.constant 9.99999997E-7 : f32
      %49 = vector.broadcast %cst_29 : f32 to vector<8x1xf32>
      %50 = arith.addf %48, %49 : vector<8x1xf32>
      %51 = math.rsqrt %50 : vector<8x1xf32>
      %52 = vector.broadcast %51 : vector<8x1xf32> to vector<8x128xf32>
      %53 = arith.mulf %43, %52 : vector<8x128xf32>
      %c0_30 = arith.constant 0 : index
      %c0_31 = arith.constant 0 : index
      %54 = vector.load %arg7[%c0_30, %c0_31] : memref<1x128xf32, #tpu.memory_space<vmem>>, vector<1x128xf32>
      %55 = vector.broadcast %54 : vector<1x128xf32> to vector<8x128xf32>
      %56 = arith.mulf %53, %55 : vector<8x128xf32>
      %c0_32 = arith.constant 0 : index
      %c0_33 = arith.constant 0 : index
      %57 = vector.load %arg8[%c0_32, %c0_33] : memref<1x128xf32, #tpu.memory_space<vmem>>, vector<1x128xf32>
      %58 = vector.broadcast %57 : vector<1x128xf32> to vector<8x128xf32>
      %59 = arith.addf %56, %58 : vector<8x128xf32>
      %60 = arith.truncf %59 : vector<8x128xf32> to vector<8x128xbf16>
      %c0_34 = arith.constant 0 : index
      %c0_35 = arith.constant 0 : index
      %61 = vector.load %arg9[%c0_34, %c0_35] : memref<8x128xbf16, #tpu.memory_space<vmem>>, vector<8x128xbf16>
      tpu.vector_store %arg9[%c0_34, %c0_35], %60 {strides = array<i32>} : memref<8x128xbf16, #tpu.memory_space<vmem>>, vector<8x128xbf16>,
    } else {
    }
    return
  }
  func.func @transform_0(%arg0: i32, %arg1: i32) -> (i32, i32) {
    %c0_i32 = arith.constant 0 : i32
    %c0_i32_0 = arith.constant 0 : i32
    return %arg0, %c0_i32 : i32, i32
  }
  func.func @transform_1(%arg0: i32, %arg1: i32) -> (i32, i32) {
    %c0_i32 = arith.constant 0 : i32
    %c0_i32_0 = arith.constant 0 : i32
    return %c0_i32, %arg1 : i32, i32
  }
  func.func @transform_2(%arg0: i32, %arg1: i32) -> (i32, i32) {
    %c0_i32 = arith.constant 0 : i32
    %c0_i32_0 = arith.constant 0 : i32
    return %c0_i32, %arg1 : i32, i32
  }
  func.func @transform_3(%arg0: i32, %arg1: i32) -> (i32, i32) {
    %c0_i32 = arith.constant 0 : i32
    %c0_i32_0 = arith.constant 0 : i32
    return %arg1, %c0_i32 : i32, i32
  }
  func.func @transform_4(%arg0: i32, %arg1: i32) -> (i32, i32) {
    %c0_i32 = arith.constant 0 : i32
    %c0_i32_0 = arith.constant 0 : i32
    %c0_i32_1 = arith.constant 0 : i32
    return %c0_i32, %c0_i32_0 : i32, i32
  }
  func.func @transform_5(%arg0: i32, %arg1: i32) -> (i32, i32) {
    %c0_i32 = arith.constant 0 : i32
    %c0_i32_0 = arith.constant 0 : i32
    %c0_i32_1 = arith.constant 0 : i32
    return %c0_i32, %c0_i32_0 : i32, i32
  }
  func.func @transform_6(%arg0: i32, %arg1: i32) -> (i32, i32) {
    %c0_i32 = arith.constant 0 : i32
    %c0_i32_0 = arith.constant 0 : i32
    %c0_i32_1 = arith.constant 0 : i32
    return %c0_i32, %c0_i32_0 : i32, i32
  }
  func.func @transform_7(%arg0: i32, %arg1: i32) -> (i32, i32) {
    %c0_i32 = arith.constant 0 : i32
    %c0_i32_0 = arith.constant 0 : i32
    return %arg0, %c0_i32 : i32, i32
  }
}

</mosaic_0001>

<bundles_post_ra>
// kernel: _encoder_forward.8
= control target key start
LH: loop header
LB: loop body
LE: loop exit
PB: predicated region body
PF: predicated region fallthrough
CT: control target
= control target key end

     0   :  { %8 = vsyncpa [#allocation3], 0  ;;  %s840_s12 = smov 0   ;;  %s842_s13 = smov 0   ;;  %s923_s0 = inlined_call_operand.vmem [shape: bf16[16,128], index: 0, kind: input, shape index: {}]   ;;  %s924_s1 = inlined_call_operand.hbm [shape: bf16[128,384], index: 1, kind: input, shape index: {}]   ;;  %s925_s2 = inlined_call_operand.vmem [shape: f32[1,384], index: 2, kind: input, shape index: {}]   ;;  %s926_s3 = inlined_call_operand.vmem [shape: bf16[16,384], index: 3, kind: output, shape index: {}]  }
   0x1   :  { %s844_s14 = smov 0  }
   0x2 LB: > { %s616_s15 = sadd.s32 4294967295, %s812_s14   ;;  %s26_s16 = sadd.s32 1, %s808_s13  ;;  %s812_s14 = sphi %s844_s14, %s14_s14   ;;  %s808_s13 = sphi %s842_s13, %s936_s13   ;;  %s804_s12 = sphi %s840_s12, %s935_s12  }
   0x3   : > { %p28_p0 = scmp.ge.s32.totalorder %s26_s16, 2  ;;  %p618_p1 = scmp.ge.s32.totalorder %s812_s14, 1 }
   0x4   : > { %p137_p2 = scmp.lt.s32.totalorder %s812_s14, 3  ;;  %p865_p4 = scmp.eq.s32.totalorder %s616_s15, 0 }
   0x5   : > { %s938_s16 = smov (%p28_p0, %s26_s16), 0  ;;  %s814_s19 = smov [#allocation2]  }
   0x6   : > { %p861_p3 = pnand %p618_p1, %p137_p2  ;;  %s152_s20 = sshll.u32 %s814_s19, 4  ;;  %s153_s20 = int_to_ptr.vmem [resolvable:$true] %s152_s20 }
   0x7   : > { %s931_s18 = scalar_select %p865_p4, 1, 0 }
   0x8   : > { %s930_s17 = scalar_select %p861_p3, 1, 0 }
   0x9   : > { %p690_p5 = pneg %p861_p3  ;;  %s758_s24 = scalar_lea.hbm %s924_s1, 3072 }
   0xa   : > { %p759_p7 = scmp.ne.s32.totalorder %s924_s1, %s758_s24  ;;  %p765_p11 = scmp.lt.u32.totalorder %s758_s24, %s924_s1 }
   0xb   : > { %p873_p6 = pnand %p865_p4, %p690_p5 }
   0xd   : > { %p760_p8 = pneg %p873_p6 }
   0xf   : > { %p761_p9 = pnand %p760_p8, %p759_p7 }
  0x11   : > { %p762_p10 = pneg %p761_p9 }
  0x13   : > { %p767_p12 = pnand %p765_p11, %p762_p10 }
  0x15   : > { %770 = shalt.err (!%p767_p12)
}
  0x16   : > { %s771_s29 = scalar_lea.vmem %s153_s20, 3072  ;;  %p779_p2 = scmp.lt.s32.totalorder %s153_s20, %s153_s20 }
  0x17   : > { %p772_p13 = scmp.ne.s32.totalorder %s153_s20, %s771_s29  ;;  %p780_p5 = scmp.lt.s32.totalorder %s771_s29, %s771_s29 }
  0x19   : > { %p774_p0 = pnand %p772_p13, %p760_p8  ;;  %p781_p4 = por %p780_p5, %p779_p2 }
  0x1b   : > { %p775_p1 = pneg %p774_p0 }
  0x1d   : > { %p782_p3 = pnand %p781_p4, %p775_p1 }
  0x1f   : > { %785 = shalt.err (!%p782_p3)
}
  0x20   : > { %s815_s30 = smov 192   ;;  %s816_s4 = smov 12  }
  0x21   : > { %693 = dma.hbm_to_vmem [thread:$0]  (!%p873_p6), %s924_s1, 3072, %s153_s20, [#allocation3], %s815_s30, %s815_s30, %s816_s4  }
  0x22   : > { %p933_p7 = scmp.ne.s32.totalorder %s930_s17, 0 }
  0x23   : > { %p934_p9 = scmp.ne.s32.totalorder (!%p933_p7), %s931_s18, 0 }
  0x24   : > { %183 = sbr.rel (%p933_p7) target bundleno = 296 (0x128), region = 32 }
  0x2b   : > { %799 = dma.done.wait (%p934_p9), [#allocation3], 3072  }
  0x2c   : > { %801 = vsyncadd (%p934_p9), [#allocation3], 4294964224  ;;  %v817_v0 = vmov 0.0   ;;  %vm818_vm0 = vmmov 0   ;;  %v819_v1 = vmov 0   ;;  %p214_p3 = scmp.lt.s32.totalorder %s804_s12, 1  ;;  %v270_v27 = vlaneseq }
  0x2d   : > { %665 = vmatprep.subr.bf16.mxu1 %v817_v0  ;;  %681 = vmatprep.mubr.msk.bf16.mxu1 %vm818_vm0, %v817_v0  ;;  %v726_v2 = vld [vmem:[#allocation2 + $0x4] ss:$12 sps:$4 sm:$0xff]   ;;  %v728_v3 = vld [vmem:[#allocation2 + $0x8] ss:$12 sps:$4 sm:$0xff]   ;;  %v729_v4 = vld [vmem:[#allocation2] ss:$12 sps:$4 sm:$0xff]  }
  0x2e   : > { %445 = vmatprep.mubr.bf16.mxu0 %v819_v1  ;;  %413 = vmatprep.subr.bf16.mxu0 %v726_v2  ;;  %v730_v5 = vld [vmem:[#allocation2 + $0x1c] ss:$12 sps:$4 sm:$0xff]   ;;  %v732_v6 = vld [vmem:[#allocation2 + $0x20] ss:$12 sps:$4 sm:$0xff]   ;;  %v733_v7 = vld [vmem:[#allocation2 + $0x18] ss:$12 sps:$4 sm:$0xff]  }
  0x2f   : > { %666 = vmatpush3.bf16.msra.mxu1 %v728_v3  ;;  %414 = vmatpush1.bf16.msra.mxu0 %v729_v4  ;;  %v734_v8 = vld [vmem:[#allocation2 + $0x34] ss:$12 sps:$4 sm:$0xff]   ;;  %v736_v9 = vld [vmem:[#allocation2 + $0x38] ss:$12 sps:$4 sm:$0xff]   ;;  %v737_v10 = vld [vmem:[#allocation2 + $0x30] ss:$12 sps:$4 sm:$0xff]  }
  0x30   : > { %667 = vmatprep.subr.bf16.mxu1 %v817_v0  ;;  %415 = vmatprep.subr.bf16.mxu0 %v730_v5  ;;  %v738_v11 = vld [vmem:[#allocation2 + $0x4c] ss:$12 sps:$4 sm:$0xff]   ;;  %v740_v12 = vld [vmem:[#allocation2 + $0x50] ss:$12 sps:$4 sm:$0xff]   ;;  %v741_v13 = vld [vmem:[#allocation2 + $0x48] ss:$12 sps:$4 sm:$0xff]  }
  0x31   : > { %v742_v14 = vld [vmem:[#allocation2 + $0x64] ss:$12 sps:$4 sm:$0xff]   ;;  %v744_v15 = vld [vmem:[#allocation2 + $0x68] ss:$12 sps:$4 sm:$0xff]   ;;  %v745_v16 = vld [vmem:[#allocation2 + $0x60] ss:$12 sps:$4 sm:$0xff]  }
  0x32   : > { %v746_v17 = vld [vmem:[#allocation2 + $0x7c] ss:$12 sps:$4 sm:$0xff]   ;;  %v748_v18 = vld [vmem:[#allocation2 + $0x80] ss:$12 sps:$4 sm:$0xff]   ;;  %v749_v19 = vld [vmem:[#allocation2 + $0x78] ss:$12 sps:$4 sm:$0xff]  }
  0x33   : > { %668 = vmatpush3.bf16.msra.mxu1 %v732_v6  ;;  %416 = vmatpush1.bf16.msra.mxu0 %v733_v7  ;;  %v750_v20 = vld [vmem:[#allocation2 + $0x94] ss:$12 sps:$4 sm:$0xff]   ;;  %s940_s12 = smov (!%p214_p3, %s804_s12), 1  ;;  %v752_v21 = vld [vmem:[#allocation2 + $0x98] ss:$12 sps:$4 sm:$0xff]   ;;  %v271_v28 = vshrl.u32 %v270_v27, 7 }
  0x34   : > { %669 = vmatprep.subr.bf16.mxu1 %v817_v0  ;;  %417 = vmatprep.subr.bf16.mxu0 %v734_v8  ;;  %v753_v22 = vld [vmem:[#allocation2 + $0x90] ss:$12 sps:$4 sm:$0xff]   ;;  %v754_v23 = vld [vmem:[#allocation2 + $0xac] ss:$12 sps:$4 sm:$0xff]   ;;  %s624_s7 = sshll.u32 %s940_s12, 2  ;;  %s685_s17 = smul.u32 12, %s940_s12 }
  0x35   : > { %v756_v24 = vld [vmem:[#allocation2 + $0xb0] ss:$12 sps:$4 sm:$0xff]   ;;  %v757_v25 = vld [vmem:[#allocation2 + $0xa8] ss:$12 sps:$4 sm:$0xff]   ;;  %s217_s10 = scalar_lea.vmem %s923_s0, %s624_s7  ;;  %v280_v29 = vsub.s32 2, %v271_v28  ;;  %v272_v31 = vsub.s32 0, %v271_v28 }
  0x36   : > { %v235_v26 = vld [vmem:[%s217_s10] sm:$0xf]  ;;  %v276_v32 = vsub.s32 1, %v271_v28  ;;  %s232_s20 = scalar_lea.vmem %s926_s3, %s685_s17 }
  0x37   : > { %670 = vmatpush3.bf16.msra.mxu1 %v736_v9  ;;  %418 = vmatpush1.bf16.msra.mxu0 %v737_v10  ;;  %v268_v30 = vld [vmem:[%s925_s2] sm:$0x7] }
  0x38   : > { %671 = vmatprep.subr.bf16.mxu1 %v817_v0  ;;  %419 = vmatprep.subr.bf16.mxu0 %v738_v11  ;;  %v281_v33 = vrot.slane %v268_v30, %v280_v29  ;;  %v273_v34 = vrot.slane %v268_v30, %v272_v31  ;;  %v277_v35 = vrot.slane %v268_v30, %v276_v32 }
  0x3b   : > { %672 = vmatpush3.bf16.msra.mxu1 %v740_v12  ;;  %420 = vmatpush1.bf16.msra.mxu0 %v741_v13 }
  0x3c   : > { %673 = vmatprep.subr.bf16.mxu1 %v817_v0  ;;  %421 = vmatprep.subr.bf16.mxu0 %v742_v14 }
  0x3f   : > { %674 = vmatpush3.bf16.msra.mxu1 %v744_v15  ;;  %422 = vmatpush1.bf16.msra.mxu0 %v745_v16 }
  0x40   : > { %675 = vmatprep.subr.bf16.mxu1 %v817_v0  ;;  %423 = vmatprep.subr.bf16.mxu0 %v746_v17 }
  0x43   : > { %676 = vmatpush3.bf16.msra.mxu1 %v748_v18  ;;  %424 = vmatpush1.bf16.msra.mxu0 %v749_v19 }
  0x44   : > { %677 = vmatprep.subr.bf16.mxu1 %v817_v0  ;;  %425 = vmatprep.subr.bf16.mxu0 %v750_v20 }
  0x47   : > { %678 = vmatpush3.bf16.msra.mxu1 %v752_v21  ;;  %426 = vmatpush1.bf16.msra.mxu0 %v753_v22 }
  0x48   : > { %679 = vmatprep.subr.bf16.mxu1 %v817_v0  ;;  %427 = vmatprep.subr.bf16.mxu0 %v754_v23 }
  0x4b   : > { %680 = vmatpush3.bf16.msra.mxu1 %v756_v24  ;;  %428 = vmatpush1.bf16.msra.mxu0 %v757_v25 }
  0x4e   : > { %682 = vmatmul.mubr.bf16.vlgmr.msra.gmra.mrb[0].mxu1 %v235_v26  ;;  %446 = vmatmul.mubr.bf16.vlgmr.msra.gmra.mrb[0].mxu0 %v235_v26 }
 0x121   : > { %v488_v36 = vpop.f32.mrb[0].mxu1  ;;  %v447_v38 = vpop.f32.mrb[0].mxu0 }
 0x122   : > { %v489_v37 = vadd.f32 %v488_v36, %v281_v33  ;;  %v683_v39 = vpop.f32.mrb[1].mxu1  ;;  %v448_v40 = vadd.f32 %v447_v38, %v273_v34  ;;  %v449_v41 = vpop.f32.mrb[1].mxu0 }
 0x123   : > { %v491_v42 = vpop.f32.mrb[2].mxu1  ;;  %v450_v44 = vadd.f32 %v449_v41, %v277_v35  ;;  %v451_v45 = vpop.f32.mrb[2].mxu0 }
 0x124   : > { %v655_v43 = vpack.c.bf16 %v489_v37, %v489_v37  ;;  %v684_v46 = vpop.f32.mrb[3].mxu1  ;;  %v452_v47 = vpop.f32.mrb[3].mxu0 }
 0x125   : > { %v654_v48 = vpack.c.bf16 %v450_v44, %v448_v40 }
 0x126   : > { %508 = vst [vmem:[%s232_s20 + $0x8] sm:$0xf] %v655_v43 }
 0x127   : > { %507 = vst [vmem:[%s232_s20] sm:$0xff] %v654_v48 }
 0x128 PF: > { %s14_s14 = sadd.s32 1, %s812_s14   ;;  %s935_s12 = smov %s808_s13 }
 0x129   : > { %p11_p4 = scmp.ge.s32.totalorder %s14_s14, 4   ;;  %s936_s13 = smov %s938_s16 }
 0x12b   :  { %13 = sbr.rel (!%p11_p4) target bundleno = 2 (0x2), region = 71 }
 0x132   :  { %539 = vsyncpa [#allocation3], 1 }
 0x133   :  { %541 = vsyncpa [#allocation3 + $0x1], 1 }

// kernel: _encoder_forward.9
= control target key start
LH: loop header
LB: loop body
LE: loop exit
PB: predicated region body
PF: predicated region fallthrough
CT: control target
= control target key end

     0   :  { %s1050_s15 = smov 0   ;;  %s1052_s16 = smov 0   ;;  %s1150_s0 = inlined_call_operand.vmem [shape: bf16[2,8,384], index: 0, kind: input, shape index: {}, may-alias: {0,1,2}]   ;;  %s1151_s1 = inlined_call_operand.vmem [shape: bf16[2,8,384], index: 1, kind: input, shape index: {}, may-alias: {0,1,2}]   ;;  %s1152_s2 = inlined_call_operand.vmem [shape: bf16[2,8,384], index: 2, kind: input, shape index: {}, may-alias: {0,1,2}]   ;;  %s1153_s3 = inlined_call_operand.vmem [shape: bf16[2,8,8], index: 3, kind: input, shape index: {}]   ;;  %s1154_s4 = inlined_call_operand.vmem [shape: bf16[2,8,128], index: 4, kind: output, shape index: {}]  }
   0x1   :  { %s1054_s17 = smov 0  }
   0x2 LB: > { %s40_s18 = sadd.s32 1, %s1014_s16  ;;  %p898_p0 = scmp.ge.s32.totalorder %s1018_s17, 1  ;;  %s1018_s17 = sphi %s1054_s17, %s14_s17   ;;  %s1014_s16 = sphi %s1052_s16, %s1156_s16   ;;  %s1010_s15 = sphi %s1050_s15, %s1155_s15  }
   0x3   : > { %p42_p1 = scmp.ge.s32.totalorder %s40_s18, 2  ;;  %p272_p2 = scmp.lt.s32.totalorder %s1018_s17, 3 }
   0x5   : > { %s1158_s18 = smov (%p42_p1, %s40_s18), 0  ;;  %p273_p3 = pnand %p898_p0, %p272_p2 }
   0x6   : > { %p346_p4 = scmp.lt.s32.totalorder (!%p273_p3), %s1010_s15, 1  ;;  %vm416_vm0 = vcmask (!%p273_p3), 523264   ;;  %v1020_v0 = vmov (!%p273_p3), 0.0   ;;  %vm1021_vm1 = vmmov (!%p273_p3), 0   ;;  %vm411_vm2 = vcmask (!%p273_p3), 7168   ;;  %s1024_s5 = smov (!%p273_p3), 64  }
   0x7   : > { %276 = sbr.rel (%p273_p3) target bundleno = 1455 (0x5af), region = 36  ;;  %925 = vmatprep.subr.bf16.mxu0 (!%p273_p3), %v1020_v0  ;;  %417 = vst.msk [vmem:[#allocation4] sm:$0xff] (!%p273_p3), %vm416_vm0, %v1020_v0  ;;  %418 = vst.msk [vmem:[#allocation4 + $0x8] sm:$0xff] (!%p273_p3), %vm416_vm0, %v1020_v0  ;;  %927 = vmatprep.mubr.msk.bf16.mxu0 (!%p273_p3), %vm1021_vm1, %v1020_v0  ;;  %v1022_v4 = vmov (!%p273_p3), -inf   ;;  %vm472_vm3 = vcmask (!%p273_p3), 64512   ;;  %v1023_v13 = vmov (!%p273_p3), 0  }
   0x8   : > { %931 = vmatprep.subr.bf16.mxu1 (!%p273_p3), %v1020_v0  ;;  %933 = vmatprep.mubr.msk.bf16.mxu1 (!%p273_p3), %vm1021_vm1, %v1020_v0  ;;  %412 = vst.msk [vmem:[#allocation2] sm:$0xff] (!%p273_p3), %vm411_vm2, %v1022_v4  ;;  %413 = vst.msk [vmem:[#allocation2 + $0x8] sm:$0xff] (!%p273_p3), %vm411_vm2, %v1022_v4  ;;  %vm507_vm4 = vcmask (!%p273_p3), 1043456  }
   0x9   : > { %414 = vst.msk [vmem:[#allocation3] sm:$0xff] (!%p273_p3), %vm411_vm2, %v1020_v0  ;;  %415 = vst.msk [vmem:[#allocation3 + $0x8] sm:$0xff] (!%p273_p3), %vm411_vm2, %v1020_v0  ;;  %981 = vset.pattern.permute.xlu0 (!%p273_p3), %v1023_v13  ;;  %982 = vset.pattern.permute.xlu1 (!%p273_p3), %v1023_v13 }
   0xe   : > { %s1160_s15 = smov (!%p346_p4, %s1010_s15), 1 }
   0xf   : > { %s1081_s19 = smul.u32 12, %s1160_s15  ;;  %s902_s27 = sshll.u32 %s1160_s15, 2  ;;  %v471_v16 = vld [vmem:[#allocation2] sm:$0xff]  ;;  %v611_v41 = vld [vmem:[#allocation2 + $0x8] sm:$0xff] }
  0x10   : > { %s395_s30 = scalar_lea.vmem %s1153_s3, %s902_s27  ;;  %v488_v58 = vld [vmem:[#allocation3] sm:$0xff]  ;;  %v628_v63 = vld [vmem:[#allocation3 + $0x8] sm:$0xff]  ;;  %s405_s12 = scalar_lea.vmem %s1154_s4, %s902_s27 }
  0x11   : > { %s914_s20 = sadd.s32 4, %s1081_s19  ;;  %s357_s26 = scalar_lea.vmem %s1150_s0, %s1081_s19  ;;  %v422_v5 = vld [vmem:[%s395_s30] sm:$0xf] }
  0x12   : > { %s370_s23 = scalar_lea.vmem %s1151_s1, %s914_s20  ;;  %v419_v3 = vld [vmem:[%s357_s26] sm:$0xf]  ;;  %v423_v6 = vunpack.c.l.bf16 %v422_v5  ;;  %s916_s6 = sadd.s32 8, %s1081_s19 }
  0x13   : > { %v420_v1 = vld [vmem:[%s370_s23] sm:$0xf]  ;;  %v906_v15 = vcombine.low %v419_v3, %v419_v3  ;;  %s384_s9 = scalar_lea.vmem %s1152_s2, %s916_s6 }
  0x14   : > { %v429_v2 = vsel %vm416_vm0, %v420_v1, 0  ;;  %v907_v14 = vcombine.low %v420_v1, %v420_v1  ;;  %v421_v20 = vld [vmem:[%s384_s9] sm:$0xf] }
  0x15   : > { %926 = vmatpush3.bf16.xpose.msra.mxu0 %v429_v2  ;;  %v509_v21 = vsel %vm507_vm4, %v421_v20, 0  ;;  %v909_v22 = vcombine.low %v421_v20, %v421_v20  ;;  %v496_v5 = vld [vmem:[#allocation4] sm:$0xff] }
  0x16   : > { %943 = vmatprep.subr.bf16.mxu0 %v1020_v0  ;;  %562 = vrot.lane.b32.xlu1 %v907_v14, %s1024_s5 }
  0x17   : > { %932 = vmatpush3.bf16.msra.mxu1 %v509_v21 }
  0x18   : > { %937 = vmatprep.subr.bf16.mxu1 %v1020_v0 }
  0x1a   : > { %557 = vrot.lane.b32.xlu1 %v906_v15, %s1024_s5 }
  0x1c   : > { %928 = vmatmul.mubr.msk.bf16.vlgmr.msra.gmra.mrb[0].mxu0 %vm416_vm0, %v419_v3 }
  0x1d   : > { %945 = vmatprep.mubr.msk.bf16.mxu0 %vm1021_vm1, %v1020_v0 }
  0x88   : > { %v563_v26 = vpop.permute.xlu1 %562 }
  0x89   : > { %v568_v28 = vsel %vm416_vm0, %v563_v26, 0 }
  0x8c   : > { %v558_v30 = vpop.permute.xlu1 %557 }
  0xef   : > { %v465_v7 = vpop.f32.mrb[0].mxu0 }
  0xf0   : > { %v466_v8 = vadd.f32 %v465_v7, %v423_v6  ;;  %v929_v9 = vpop.f32.mrb[1].mxu0 }
  0xf1   : > { %v468_v10 = vpop.f32.mrb[2].mxu0  ;;  %v636_v9 = vld [vmem:[#allocation4 + $0x8] sm:$0xff] }
  0xf2   : > { %v930_v11 = vpop.f32.mrb[3].mxu0  ;;  %v473_v12 = vsel %vm472_vm3, %v466_v8, -inf }
  0xf3   : > { %474 = vmax.xlane.f32.xlu0 %v473_v12 }
 0x180   : > { %v475_v17 = vpop.xlane.xlu0 %474 }
 0x181   : > { %v476_v18 = vmax.f32 %v471_v16, %v475_v17 }
 0x183   : > { %v477_v19 = vsub.f32 %v471_v16, %v476_v18  ;;  %553 = vst.msk [vmem:[#allocation2] sm:$0xff] %vm411_vm2, %v476_v18  ;;  %482 = vperm.xlu0 %981, %v476_v18  }
 0x185   : > { %v478_v55 = vmul.f32 1.442695, %v477_v19 }
 0x187   : > { %647 = vrot.lane.b32.xlu0 %v909_v22, %s1024_s5 }
 0x202   : > { %v483_v23 = vpop.permute.xlu0 %482 }
 0x203   : > { %v485_v24 = vsub.f32 %v466_v8, %v483_v23 }
 0x205   : > { %v486_v25 = vmul.f32 1.442695, %v485_v24 }
 0x206   : > { %v648_v45 = vpop.permute.xlu0 %647 }
 0x207   : > { %984 = vpow2.f32 %v486_v25  ;;  %v653_v46 = vsel %vm507_vm4, %v648_v45, 0 }
 0x208   : > { %944 = vmatpush3.bf16.msra.mxu0 %v653_v46 }
 0x211   : > { %v985_v27 = vpop.eup %984 }
 0x212   : > { %v503_v29 = vpack.c.bf16 %v985_v27, %v985_v27  ;;  %v490_v47 = vsel %vm472_vm3, %v985_v27, 0.0 }
 0x214   : > { %934 = vmatmul.mubr.msk.bf16.vlgmr.msra.gmra.mrb[0].mxu1 %vm472_vm3, %v503_v29 }
 0x215   : > { %938 = vmatpush3.bf16.xpose.msra.mxu1 %v568_v28  ;;  %939 = vmatprep.mubr.msk.bf16.mxu1 %vm1021_vm1, %v1020_v0 }
 0x21c   : > { %940 = vmatmul.mubr.msk.bf16.vlgmr.msra.gmra.mrb[4].mxu1 %vm416_vm0, %v558_v30 }
 0x2e7   : > { %v545_v31 = vpop.f32.mrb[0].mxu1 }
 0x2e8   : > { %v935_v32 = vpop.f32.mrb[1].mxu1 }
 0x2e9   : > { %v548_v33 = vpop.f32.mrb[2].mxu1 }
 0x2ea   : > { %v936_v34 = vpop.f32.mrb[3].mxu1 }
 0x2ef   : > { %v604_v35 = vpop.f32.mrb[4].mxu1 }
 0x2f0   : > { %v605_v36 = vadd.f32 %v604_v35, %v423_v6  ;;  %v941_v37 = vpop.f32.mrb[5].mxu1 }
 0x2f1   : > { %v607_v38 = vpop.f32.mrb[6].mxu1 }
 0x2f2   : > { %v942_v39 = vpop.f32.mrb[7].mxu1  ;;  %v612_v40 = vsel %vm472_vm3, %v605_v36, -inf }
 0x2f3   : > { %613 = vmax.xlane.f32.xlu1 %v612_v40 }
 0x380   : > { %v614_v42 = vpop.xlane.xlu1 %613 }
 0x381   : > { %v615_v43 = vmax.f32 %v611_v41, %v614_v42 }
 0x383   : > { %v616_v44 = vsub.f32 %v611_v41, %v615_v43  ;;  %697 = vst.msk [vmem:[#allocation2 + $0x8] sm:$0xff] %vm411_vm2, %v615_v43  ;;  %621 = vperm.xlu1 %982, %v615_v43  }
 0x385   : > { %v617_v54 = vmul.f32 1.442695, %v616_v44 }
 0x3a7   : > { %491 = vadd.xlane.f32.xlu1 %v490_v47 }
 0x402   : > { %v622_v48 = vpop.permute.xlu1 %621 }
 0x403   : > { %v624_v49 = vsub.f32 %v605_v36, %v622_v48 }
 0x405   : > { %v625_v50 = vmul.f32 1.442695, %v624_v49 }
 0x407   : > { %986 = vpow2.f32 %v625_v50 }
 0x408   : > { %988 = vpow2.f32 %v617_v54 }
 0x409   : > { %990 = vpow2.f32 %v478_v55 }
 0x411   : > { %v987_v51 = vpop.eup %986 }
 0x412   : > { %v630_v52 = vsel %vm472_vm3, %v987_v51, 0.0  ;;  %v643_v53 = vpack.c.bf16 %v987_v51, %v987_v51  ;;  %v989_v56 = vpop.eup %988 }
 0x413   : > { %631 = vadd.xlane.f32.xlu0 %v630_v52  ;;  %v991_v57 = vpop.eup %990  ;;  %v629_v0 = vmul.f32 %v989_v56, %v628_v63 }
 0x414   : > { %946 = vmatmul.mubr.msk.bf16.vlgmr.msra.gmra.mrb[4].mxu0 %vm472_vm3, %v643_v53  ;;  %v489_v59 = vmul.f32 %v991_v57, %v488_v58 }
 0x429   : > { %639 = vperm.xlu0 %981, %v989_v56  }
 0x42d   : > { %499 = vperm.xlu0 %981, %v991_v57  }
 0x434   : > { %v492_v60 = vpop.xlane.xlu1 %491 }
 0x435   : > { %v493_v61 = vadd.f32 %v492_v60, %v489_v59 }
 0x437   : > { %495 = vst.msk [vmem:[#allocation3] sm:$0xff] %vm411_vm2, %v493_v61 }
 0x43e   : > { %v702_v62 = vld [vmem:[#allocation3] sm:$0xff] }
 0x43f   : > { %705 = vperm.xlu0 %981, %v702_v62  }
 0x4a0   : > { %v632_v1 = vpop.xlane.xlu0 %631 }
 0x4a1   : > { %v633_v2 = vadd.f32 %v632_v1, %v629_v0 }
 0x4a3   : > { %634 = vst.msk [vmem:[#allocation3 + $0x8] sm:$0xff] %vm411_vm2, %v633_v2 }
 0x4a8   : > { %v640_v3 = vpop.permute.xlu0 %639 }
 0x4a9   : > { %v642_v10 = vmul.f32 %v640_v3, %v636_v9 }
 0x4aa   : > { %v712_v4 = vld [vmem:[#allocation3 + $0x8] sm:$0xff] }
 0x4ab   : > { %715 = vperm.xlu1 %982, %v712_v4  }
 0x4ac   : > { %v500_v6 = vpop.permute.xlu0 %499 }
 0x4ad   : > { %v502_v7 = vmul.f32 %v500_v6, %v496_v5 }
 0x4af   : > { %v551_v8 = vadd.f32 %v545_v31, %v502_v7 }
 0x4b1   : > { %552 = vst.msk [vmem:[#allocation4] sm:$0xff] %vm416_vm0, %v551_v8 }
 0x4b8   : > { %v701_v23 = vld [vmem:[#allocation4] sm:$0xff] }
 0x4be   : > { %v706_v21 = vpop.permute.xlu0 %705 }
 0x4e7   : > { %v689_v11 = vpop.f32.mrb[4].mxu0 }
 0x4e8   : > { %v695_v12 = vadd.f32 %v689_v11, %v642_v10  ;;  %v947_v13 = vpop.f32.mrb[5].mxu0 }
 0x4e9   : > { %v692_v14 = vpop.f32.mrb[6].mxu0 }
 0x4ea   : > { %696 = vst.msk [vmem:[#allocation4 + $0x8] sm:$0xff] %vm416_vm0, %v695_v12  ;;  %v948_v15 = vpop.f32.mrb[7].mxu0 }
 0x4f1   : > { %v711_v18 = vld [vmem:[#allocation4 + $0x8] sm:$0xff] }
 0x52a   : > { %v716_v16 = vpop.permute.xlu1 %715 }
 0x52b   : > { %992 = vrcp.f32 %v716_v16 }
 0x52c   : > { %994 = vrcp.f32 %v706_v21 }
 0x535   : > { %v993_v17 = vpop.eup %992 }
 0x536   : > { %v719_v19 = vmul.f32 %v993_v17, %v711_v18  ;;  %v995_v22 = vpop.eup %994 }
 0x537   : > { %v709_v24 = vmul.f32 %v995_v22, %v701_v23 }
 0x538   : > { %v720_v20 = vpack.c.bf16 %v719_v19, %v719_v19 }
 0x539   : > { %v710_v25 = vpack.c.bf16 %v709_v24, %v709_v24 }
 0x53a   : > { %722 = vrot.lane.b32.xlu0 %v720_v20, %s1024_s5 }
 0x5ac   : > { %v723_v26 = vpop.permute.xlu0 %722 }
 0x5ad   : > { %v726_v27 = vsel %vm416_vm0, %v710_v25, %v723_v26 }
 0x5ae   : > { %728 = vst [vmem:[%s405_s12] sm:$0xf] %v726_v27 }
 0x5af PF: > { %s14_s17 = sadd.s32 1, %s1018_s17   ;;  %s1155_s15 = smov %s1014_s16 }
 0x5b0   : > { %p11_p5 = scmp.ge.s32.totalorder %s14_s17, 4   ;;  %s1156_s16 = smov %s1158_s18 }
 0x5b2   :  { %13 = sbr.rel (!%p11_p5) target bundleno = 2 (0x2), region = 86 }

// kernel: _encoder_forward.10
= control target key start
LH: loop header
LB: loop body
LE: loop exit
PB: predicated region body
PF: predicated region fallthrough
CT: control target
= control target key end

     0   :  { %s708_s21 = smov 0   ;;  %s710_s22 = smov 0   ;;  %s786_s0 = inlined_call_operand.vmem [shape: bf16[16,128], index: 0, kind: input, shape index: {}]   ;;  %s787_s1 = inlined_call_operand.vmem [shape: bf16[128,128], index: 1, kind: input, shape index: {}]   ;;  %s788_s2 = inlined_call_operand.vmem [shape: f32[1,128], index: 2, kind: input, shape index: {}]   ;;  %s789_s3 = inlined_call_operand.vmem [shape: bf16[16,128], index: 3, kind: input, shape index: {}]   ;;  %s790_s4 = inlined_call_operand.vmem [shape: f32[1,128], index: 4, kind: input, shape index: {}]   ;;  %s791_s5 = inlined_call_operand.vmem [shape: f32[1,128], index: 5, kind: input, shape index: {}]   ;;  %s792_s6 = inlined_call_operand.vmem [shape: bf16[16,128], index: 6, kind: output, shape index: {}]  }
   0x1   :  { %s712_s23 = smov 0  }
   0x2 LB: > { %s28_s24 = sadd.s32 1, %s665_s22  ;;  %p565_p0 = scmp.ge.s32.totalorder %s669_s23, 1  ;;  %s669_s23 = sphi %s712_s23, %s16_s23   ;;  %s665_s22 = sphi %s710_s22, %s794_s22   ;;  %s661_s21 = sphi %s708_s21, %s793_s21  }
   0x3   : > { %p30_p1 = scmp.ge.s32.totalorder %s28_s24, 2  ;;  %p248_p2 = scmp.lt.s32.totalorder %s669_s23, 3 }
   0x5   : > { %s796_s24 = smov (%p30_p1, %s28_s24), 0  ;;  %p249_p3 = pnand %p565_p0, %p248_p2 }
   0x6   : > { %v637_v0 = vld [vmem:[%s787_s1] sm:$0xff] (!%p249_p3)   ;;  %v671_v1 = vmov (!%p249_p3), 0.0   ;;  %v638_v2 = vld [vmem:[%s787_s1 + $0x8] sm:$0xff] (!%p249_p3)   ;;  %vm672_vm0 = vmmov (!%p249_p3), 0   ;;  %v639_v3 = vld [vmem:[%s787_s1 + $0x10] sm:$0xff] (!%p249_p3)   ;;  %p288_p4 = scmp.lt.s32.totalorder (!%p249_p3), %s661_s21, 1 }
   0x7   : > { %252 = sbr.rel (%p249_p3) target bundleno = 569 (0x239), region = 44  ;;  %591 = vmatprep.subr.bf16.mxu0 (!%p249_p3), %v671_v1  ;;  %607 = vmatprep.mubr.msk.bf16.mxu0 (!%p249_p3), %vm672_vm0, %v671_v1  ;;  %v640_v4 = vld [vmem:[%s787_s1 + $0x18] sm:$0xff] (!%p249_p3)   ;;  %v641_v5 = vld [vmem:[%s787_s1 + $0x20] sm:$0xff] (!%p249_p3)   ;;  %v642_v6 = vld [vmem:[%s787_s1 + $0x28] sm:$0xff] (!%p249_p3)  }
   0x8   : > { %592 = vmatpush3.bf16.msra.mxu0 (!%p249_p3), %v637_v0  ;;  %v643_v7 = vld [vmem:[%s787_s1 + $0x30] sm:$0xff] (!%p249_p3)   ;;  %v644_v8 = vld [vmem:[%s787_s1 + $0x38] sm:$0xff] (!%p249_p3)   ;;  %v577_v11 = vld [vmem:[%s788_s2] ss:$0 sm:$0xff] (!%p249_p3) }
   0x9   : > { %593 = vmatprep.subr.bf16.mxu0 (!%p249_p3), %v671_v1  ;;  %v578_v27 = vld [vmem:[%s790_s4] ss:$0 sm:$0xff] (!%p249_p3) }
   0xa   : > { %v579_v29 = vld [vmem:[%s791_s5] ss:$0 sm:$0xff] (!%p249_p3) }
   0xc   : > { %594 = vmatpush3.bf16.msra.mxu0 (!%p249_p3), %v638_v2 }
   0xd   : > { %595 = vmatprep.subr.bf16.mxu0 (!%p249_p3), %v671_v1 }
   0xe   : > { %s798_s21 = smov (!%p288_p4, %s661_s21), 1 }
   0xf   : > { %s751_s15 = sshll.u32 %s798_s21, 2 }
  0x10   : > { %596 = vmatpush3.bf16.msra.mxu0 %v639_v3  ;;  %s294_s20 = scalar_lea.vmem %s786_s0, %s751_s15  ;;  %s304_s21 = scalar_lea.vmem %s789_s3, %s751_s15 }
  0x11   : > { %597 = vmatprep.subr.bf16.mxu0 %v671_v1  ;;  %v316_v9 = vld [vmem:[%s294_s20] sm:$0xf]  ;;  %s308_s11 = scalar_lea.vmem %s792_s6, %s751_s15 }
  0x12   : > { %v435_v10 = vld [vmem:[%s304_s21] sm:$0xf] }
  0x13   : > { %v436_v12 = vunpack.c.l.bf16 %v435_v10 }
  0x14   : > { %598 = vmatpush3.bf16.msra.mxu0 %v640_v4 }
  0x15   : > { %599 = vmatprep.subr.bf16.mxu0 %v671_v1 }
  0x18   : > { %600 = vmatpush3.bf16.msra.mxu0 %v641_v5 }
  0x19   : > { %601 = vmatprep.subr.bf16.mxu0 %v671_v1 }
  0x1c   : > { %602 = vmatpush3.bf16.msra.mxu0 %v642_v6 }
  0x1d   : > { %603 = vmatprep.subr.bf16.mxu0 %v671_v1 }
  0x20   : > { %604 = vmatpush3.bf16.msra.mxu0 %v643_v7 }
  0x21   : > { %605 = vmatprep.subr.bf16.mxu0 %v671_v1 }
  0x24   : > { %606 = vmatpush3.bf16.msra.mxu0 %v644_v8 }
  0x27   : > { %608 = vmatmul.mubr.bf16.vlgmr.msra.gmra.mrb[0].mxu0 %v316_v9 }
  0xfa   : > { %v415_v13 = vpop.f32.mrb[0].mxu0 }
  0xfb   : > { %v434_v14 = vadd.f32 %v577_v11, %v415_v13  ;;  %v609_v15 = vpop.f32.mrb[1].mxu0 }
  0xfc   : > { %v418_v16 = vpop.f32.mrb[2].mxu0 }
  0xfd   : > { %v610_v17 = vpop.f32.mrb[3].mxu0  ;;  %v437_v18 = vadd.f32 %v436_v12, %v434_v14 }
  0xff   : > { %438 = vadd.xlane.f32.xlu0 %v437_v18 }
 0x18c   : > { %v439_v19 = vpop.xlane.xlu0 %438 }
 0x18d   : > { %v441_v20 = vmul.f32 0.0078125, %v439_v19 }
 0x18f   : > { %v442_v21 = vsub.f32 %v437_v18, %v441_v20 }
 0x191   : > { %v443_v22 = vmul.f32 %v442_v21, %v442_v21 }
 0x193   : > { %444 = vadd.xlane.f32.xlu0 %v443_v22 }
 0x220   : > { %v445_v23 = vpop.xlane.xlu0 %444 }
 0x221   : > { %v446_v24 = vmul.f32 0.0078125, %v445_v23 }
 0x223   : > { %v447_v25 = vadd.f32 1e-06, %v446_v24 }
 0x225   : > { %645 = vrsqrt.f32 %v447_v25 }
 0x22f   : > { %v646_v26 = vpop.eup %645 }
 0x230   : > { %v449_v28 = vmul.f32 %v646_v26, %v442_v21 }
 0x232   : > { %v457_v30 = vmul.f32 %v578_v27, %v449_v28 }
 0x234   : > { %v465_v31 = vadd.f32 %v579_v29, %v457_v30 }
 0x236   : > { %v466_v32 = vpack.c.bf16 %v465_v31, %v465_v31 }
 0x238   : > { %467 = vst [vmem:[%s308_s11] sm:$0xf] %v466_v32 }
 0x239 PF: > { %s16_s23 = sadd.s32 1, %s669_s23   ;;  %s793_s21 = smov %s665_s22 }
 0x23a   : > { %p13_p5 = scmp.ge.s32.totalorder %s16_s23, 4   ;;  %s794_s22 = smov %s796_s24 }
 0x23c   :  { %15 = sbr.rel (!%p13_p5) target bundleno = 2 (0x2), region = 88 }

// kernel: _encoder_forward.11
= control target key start
LH: loop header
LB: loop body
LE: loop exit
PB: predicated region body
PF: predicated region fallthrough
CT: control target
= control target key end

     0   :  { %12 = vsyncpa [#allocation4], 0  ;;  %s1533_s24 = smov 0   ;;  %s1535_s25 = smov 0   ;;  %s1728_s0 = inlined_call_operand.vmem [shape: bf16[16,128], index: 0, kind: input, shape index: {}]   ;;  %s1729_s1 = inlined_call_operand.vmem [shape: bf16[128,512], index: 1, kind: input, shape index: {}]   ;;  %s1730_s2 = inlined_call_operand.vmem [shape: f32[1,512], index: 2, kind: input, shape index: {}]   ;;  %s1731_s3 = inlined_call_operand.hbm [shape: bf16[512,128], index: 3, kind: input, shape index: {}]   ;;  %s1732_s4 = inlined_call_operand.vmem [shape: f32[1,128], index: 4, kind: input, shape index: {}]   ;;  %s1733_s5 = inlined_call_operand.vmem [shape: f32[1,128], index: 5, kind: input, shape index: {}]   ;;  %s1734_s6 = inlined_call_operand.vmem [shape: f32[1,128], index: 6, kind: input, shape index: {}]   ;;  %s1735_s7 = inlined_call_operand.vmem [shape: bf16[16,128], index: 7, kind: output, shape index: {}]  }
   0x1   :  { %s1537_s26 = smov 0  }
   0x2 LB: > { %s1181_s27 = sadd.s32 4294967295, %s1487_s26   ;;  %s30_s28 = sadd.s32 1, %s1483_s25  ;;  %s1487_s26 = sphi %s1537_s26, %s18_s26   ;;  %s1483_s25 = sphi %s1535_s25, %s1745_s25   ;;  %s1479_s24 = sphi %s1533_s24, %s1744_s24  }
   0x3   : > { %p32_p0 = scmp.ge.s32.totalorder %s30_s28, 2  ;;  %p1183_p1 = scmp.ge.s32.totalorder %s1487_s26, 1 }
   0x4   : > { %p228_p2 = scmp.lt.s32.totalorder %s1487_s26, 3  ;;  %p1558_p4 = scmp.eq.s32.totalorder %s1181_s27, 0 }
   0x5   : > { %s1747_s28 = smov (%p32_p0, %s30_s28), 0  ;;  %s1489_s8 = smov [#allocation3]  }
   0x6   : > { %p1554_p3 = pnand %p1183_p1, %p228_p2  ;;  %s260_s9 = sshll.u32 %s1489_s8, 4  ;;  %s261_s9 = int_to_ptr.vmem [resolvable:$true] %s260_s9 }
   0x7   : > { %s1740_s30 = scalar_select %p1558_p4, 1, 0 }
   0x8   : > { %s1739_s29 = scalar_select %p1554_p3, 1, 0 }
   0x9   : > { %p1309_p5 = pneg %p1554_p3  ;;  %s1433_s13 = scalar_lea.hbm %s1731_s3, 4096 }
   0xa   : > { %p1434_p7 = scmp.ne.s32.totalorder %s1731_s3, %s1433_s13  ;;  %p1440_p11 = scmp.lt.u32.totalorder %s1433_s13, %s1731_s3 }
   0xb   : > { %p1566_p6 = pnand %p1558_p4, %p1309_p5 }
   0xd   : > { %p1435_p8 = pneg %p1566_p6 }
   0xf   : > { %p1436_p9 = pnand %p1435_p8, %p1434_p7 }
  0x11   : > { %p1437_p10 = pneg %p1436_p9 }
  0x13   : > { %p1442_p12 = pnand %p1440_p11, %p1437_p10 }
  0x15   : > { %1445 = shalt.err (!%p1442_p12)
}
  0x16   : > { %s1446_s18 = scalar_lea.vmem %s261_s9, 4096  ;;  %p1454_p2 = scmp.lt.s32.totalorder %s261_s9, %s261_s9 }
  0x17   : > { %p1447_p13 = scmp.ne.s32.totalorder %s261_s9, %s1446_s18  ;;  %p1455_p5 = scmp.lt.s32.totalorder %s1446_s18, %s1446_s18 }
  0x19   : > { %p1449_p0 = pnand %p1447_p13, %p1435_p8  ;;  %p1456_p4 = por %p1455_p5, %p1454_p2 }
  0x1b   : > { %p1450_p1 = pneg %p1449_p0 }
  0x1d   : > { %p1457_p3 = pnand %p1456_p4, %p1450_p1 }
  0x1f   : > { %1460 = shalt.err (!%p1457_p3)
}
  0x20   : > { %s1490_s19 = smov 64   ;;  %s1491_s20 = smov 4  }
  0x21   : > { %1312 = dma.hbm_to_vmem [thread:$0]  (!%p1566_p6), %s1731_s3, 4096, %s261_s9, [#allocation4], %s1490_s19, %s1490_s19, %s1491_s20  }
  0x22   : > { %p1742_p7 = scmp.ne.s32.totalorder %s1739_s29, 0 }
  0x23   : > { %p1743_p9 = scmp.ne.s32.totalorder (!%p1742_p7), %s1740_s30, 0 }
  0x24   : > { %292 = sbr.rel (%p1742_p7) target bundleno = 857 (0x359), region = 48 }
  0x2b   : > { %1474 = dma.done.wait (%p1743_p9), [#allocation4], 4096  }
  0x2c   : > { %1476 = vsyncadd (%p1743_p9), [#allocation4], 4294963200  ;;  %v1492_v0 = vmov 0   ;;  %v1343_v1 = vld [vmem:[%s1729_s1 + $0x4] ss:$16 sps:$4 sm:$0xff]   ;;  %p331_p3 = scmp.lt.s32.totalorder %s1479_s24, 1 }
  0x2d   : > { %604 = vmatprep.mubr.bf16.mxu0 %v1492_v0  ;;  %645 = vmatprep.mubr.bf16.mxu1 %v1492_v0  ;;  %v1345_v2 = vld [vmem:[%s1729_s1 + $0xc] ss:$16 sps:$4 sm:$0xff]   ;;  %v1347_v3 = vld [vmem:[%s1729_s1] ss:$16 sps:$4 sm:$0xff]   ;;  %v1348_v4 = vld [vmem:[%s1729_s1 + $0x8] ss:$16 sps:$4 sm:$0xff]  }
  0x2e   : > { %572 = vmatprep.subr.bf16.mxu0 %v1343_v1  ;;  %613 = vmatprep.subr.bf16.mxu1 %v1345_v2  ;;  %v1349_v5 = vld [vmem:[%s1729_s1 + $0x24] ss:$16 sps:$4 sm:$0xff]   ;;  %v1351_v6 = vld [vmem:[%s1729_s1 + $0x2c] ss:$16 sps:$4 sm:$0xff]   ;;  %v1353_v7 = vld [vmem:[%s1729_s1 + $0x20] ss:$16 sps:$4 sm:$0xff]   ;;  %v392_v2 = vlaneseq }
  0x2f   : > { %573 = vmatpush1.bf16.msra.mxu0 %v1347_v3  ;;  %614 = vmatpush1.bf16.msra.mxu1 %v1348_v4  ;;  %v1354_v8 = vld [vmem:[%s1729_s1 + $0x28] ss:$16 sps:$4 sm:$0xff]   ;;  %v1355_v9 = vld [vmem:[%s1729_s1 + $0x44] ss:$16 sps:$4 sm:$0xff]   ;;  %v1357_v10 = vld [vmem:[%s1729_s1 + $0x4c] ss:$16 sps:$4 sm:$0xff]  }
  0x30   : > { %574 = vmatprep.subr.bf16.mxu0 %v1349_v5  ;;  %615 = vmatprep.subr.bf16.mxu1 %v1351_v6  ;;  %v1359_v11 = vld [vmem:[%s1729_s1 + $0x40] ss:$16 sps:$4 sm:$0xff]   ;;  %v1360_v12 = vld [vmem:[%s1729_s1 + $0x48] ss:$16 sps:$4 sm:$0xff]   ;;  %v1361_v13 = vld [vmem:[%s1729_s1 + $0x64] ss:$16 sps:$4 sm:$0xff]  }
  0x31   : > { %v1363_v14 = vld [vmem:[%s1729_s1 + $0x6c] ss:$16 sps:$4 sm:$0xff]   ;;  %v1365_v15 = vld [vmem:[%s1729_s1 + $0x60] ss:$16 sps:$4 sm:$0xff]   ;;  %v1366_v16 = vld [vmem:[%s1729_s1 + $0x68] ss:$16 sps:$4 sm:$0xff]  }
  0x32   : > { %v1367_v17 = vld [vmem:[%s1729_s1 + $0x84] ss:$16 sps:$4 sm:$0xff]   ;;  %v1369_v18 = vld [vmem:[%s1729_s1 + $0x8c] ss:$16 sps:$4 sm:$0xff]   ;;  %v1371_v19 = vld [vmem:[%s1729_s1 + $0x80] ss:$16 sps:$4 sm:$0xff]  }
  0x33   : > { %575 = vmatpush1.bf16.msra.mxu0 %v1353_v7  ;;  %616 = vmatpush1.bf16.msra.mxu1 %v1354_v8  ;;  %v1372_v20 = vld [vmem:[%s1729_s1 + $0x88] ss:$16 sps:$4 sm:$0xff]   ;;  %v1373_v21 = vld [vmem:[%s1729_s1 + $0xa4] ss:$16 sps:$4 sm:$0xff]   ;;  %v1375_v22 = vld [vmem:[%s1729_s1 + $0xac] ss:$16 sps:$4 sm:$0xff]  }
  0x34   : > { %576 = vmatprep.subr.bf16.mxu0 %v1355_v9  ;;  %617 = vmatprep.subr.bf16.mxu1 %v1357_v10  ;;  %s1749_s24 = smov (!%p331_p3, %s1479_s24), 1  ;;  %v1377_v23 = vld [vmem:[%s1729_s1 + $0xa0] ss:$16 sps:$4 sm:$0xff]   ;;  %v1378_v24 = vld [vmem:[%s1729_s1 + $0xa8] ss:$16 sps:$4 sm:$0xff]   ;;  %v393_v3 = vshrl.u32 %v392_v2, 7 }
  0x35   : > { %v1379_v25 = vld [vmem:[%s1729_s1 + $0xc4] ss:$16 sps:$4 sm:$0xff]   ;;  %v1381_v26 = vld [vmem:[%s1729_s1 + $0xcc] ss:$16 sps:$4 sm:$0xff]   ;;  %s1190_s18 = sshll.u32 %s1749_s24, 2 }
  0x36   : > { %v1383_v27 = vld [vmem:[%s1729_s1 + $0xc0] ss:$16 sps:$4 sm:$0xff]   ;;  %v1384_v28 = vld [vmem:[%s1729_s1 + $0xc8] ss:$16 sps:$4 sm:$0xff]   ;;  %v1385_v29 = vld [vmem:[%s1729_s1 + $0xe4] ss:$16 sps:$4 sm:$0xff]   ;;  %s1698_s14 = scalar_lea.vmem %s1728_s0, %s1190_s18  ;;  %s350_s10 = scalar_lea.vmem %s1735_s7, %s1190_s18 }
  0x37   : > { %577 = vmatpush1.bf16.msra.mxu0 %v1359_v11  ;;  %618 = vmatpush1.bf16.msra.mxu1 %v1360_v12  ;;  %v1387_v30 = vld [vmem:[%s1729_s1 + $0xec] ss:$16 sps:$4 sm:$0xff]   ;;  %v1389_v31 = vld [vmem:[%s1729_s1 + $0xe0] ss:$16 sps:$4 sm:$0xff]   ;;  %v1390_v32 = vld [vmem:[%s1729_s1 + $0xe8] ss:$16 sps:$4 sm:$0xff]  }
  0x38   : > { %578 = vmatprep.subr.bf16.mxu0 %v1361_v13  ;;  %619 = vmatprep.subr.bf16.mxu1 %v1363_v14  ;;  %v357_v33 = vld [vmem:[%s1698_s14] sm:$0xf]  ;;  %v1395_v38 = vld [vmem:[#allocation3 + $0x48] sm:$0xff]   ;;  %v1399_v42 = vld [vmem:[#allocation3 + $0x50] sm:$0xff]   ;;  %v394_v4 = vsub.s32 0, %v393_v3  ;;  %v402_v5 = vsub.s32 2, %v393_v3 }
  0x39   : > { %v1391_v34 = vld [vmem:[#allocation3 + $0x40] sm:$0xff]   ;;  %v1396_v39 = vld [vmem:[#allocation3 + $0xc8] sm:$0xff]   ;;  %v1400_v43 = vld [vmem:[#allocation3 + $0xd0] sm:$0xff]   ;;  %v398_v7 = vsub.s32 1, %v393_v3  ;;  %v406_v8 = vsub.s32 3, %v393_v3 }
  0x3a   : > { %v1392_v35 = vld [vmem:[#allocation3 + $0xc0] sm:$0xff]   ;;  %v1397_v40 = vld [vmem:[#allocation3 + $0x8] sm:$0xff]   ;;  %v1401_v44 = vld [vmem:[#allocation3 + $0x10] sm:$0xff]  }
  0x3b   : > { %579 = vmatpush1.bf16.msra.mxu0 %v1365_v15  ;;  %620 = vmatpush1.bf16.msra.mxu1 %v1366_v16  ;;  %v1393_v36 = vld [vmem:[#allocation3] sm:$0xff]   ;;  %v1398_v41 = vld [vmem:[#allocation3 + $0x88] sm:$0xff]   ;;  %v1402_v45 = vld [vmem:[#allocation3 + $0x90] sm:$0xff]  }
  0x3c   : > { %580 = vmatprep.subr.bf16.mxu0 %v1367_v17  ;;  %621 = vmatprep.subr.bf16.mxu1 %v1369_v18  ;;  %v1394_v37 = vld [vmem:[#allocation3 + $0x80] sm:$0xff]   ;;  %v1403_v46 = vld [vmem:[#allocation3 + $0x58] sm:$0xff]   ;;  %v1411_v54 = vld [vmem:[#allocation3 + $0x68] sm:$0xff]  }
  0x3d   : > { %v1404_v47 = vld [vmem:[#allocation3 + $0xd8] sm:$0xff]   ;;  %v1407_v50 = vld [vmem:[#allocation3 + $0x60] sm:$0xff]   ;;  %v1412_v55 = vld [vmem:[#allocation3 + $0xe8] sm:$0xff]  }
  0x3e   : > { %v1405_v48 = vld [vmem:[#allocation3 + $0x18] sm:$0xff]   ;;  %v1408_v51 = vld [vmem:[#allocation3 + $0xe0] sm:$0xff]   ;;  %v1413_v56 = vld [vmem:[#allocation3 + $0x28] sm:$0xff]  }
  0x3f   : > { %581 = vmatpush1.bf16.msra.mxu0 %v1371_v19  ;;  %622 = vmatpush1.bf16.msra.mxu1 %v1372_v20  ;;  %v1406_v49 = vld [vmem:[#allocation3 + $0x98] sm:$0xff]   ;;  %v1409_v52 = vld [vmem:[#allocation3 + $0x20] sm:$0xff]   ;;  %v1414_v57 = vld [vmem:[#allocation3 + $0xa8] sm:$0xff]  }
  0x40   : > { %582 = vmatprep.subr.bf16.mxu0 %v1373_v21  ;;  %623 = vmatprep.subr.bf16.mxu1 %v1375_v22  ;;  %v1410_v53 = vld [vmem:[#allocation3 + $0xa0] sm:$0xff]   ;;  %v1415_v58 = vld [vmem:[#allocation3 + $0x70] sm:$0xff]   ;;  %v1419_v62 = vld [vmem:[#allocation3 + $0x78] sm:$0xff]  }
  0x41   : > { %v1416_v59 = vld [vmem:[#allocation3 + $0xf0] sm:$0xff]   ;;  %v1420_v63 = vld [vmem:[#allocation3 + $0xf8] sm:$0xff]   ;;  %v390_v6 = vld [vmem:[%s1730_s2] sm:$0xf] }
  0x42   : > { %v1417_v60 = vld [vmem:[#allocation3 + $0x30] sm:$0xff]   ;;  %v1421_v0 = vld [vmem:[#allocation3 + $0x38] sm:$0xff]   ;;  %v395_v9 = vrot.slane %v390_v6, %v394_v4  ;;  %v403_v10 = vrot.slane %v390_v6, %v402_v5  ;;  %v399_v11 = vrot.slane %v390_v6, %v398_v7  ;;  %v407_v12 = vrot.slane %v390_v6, %v406_v8  ;;  %v1045_v7 = vld [vmem:[%s1698_s14] sm:$0xf] }
  0x43   : > { %583 = vmatpush1.bf16.msra.mxu0 %v1377_v23  ;;  %624 = vmatpush1.bf16.msra.mxu1 %v1378_v24  ;;  %v1418_v61 = vld [vmem:[#allocation3 + $0xb0] sm:$0xff]   ;;  %v1422_v1 = vld [vmem:[#allocation3 + $0xb8] sm:$0xff]  }
  0x44   : > { %584 = vmatprep.subr.bf16.mxu0 %v1379_v25  ;;  %625 = vmatprep.subr.bf16.mxu1 %v1381_v26 }
  0x47   : > { %585 = vmatpush1.bf16.msra.mxu0 %v1383_v27  ;;  %626 = vmatpush1.bf16.msra.mxu1 %v1384_v28 }
  0x48   : > { %586 = vmatprep.subr.bf16.mxu0 %v1385_v29  ;;  %627 = vmatprep.subr.bf16.mxu1 %v1387_v30 }
  0x4b   : > { %587 = vmatpush1.bf16.msra.mxu0 %v1389_v31  ;;  %628 = vmatpush1.bf16.msra.mxu1 %v1390_v32 }
  0x4c   : > { %1261 = vmatprep.subr.bf16.mxu0 %v1391_v34  ;;  %1283 = vmatprep.subr.bf16.mxu1 %v1392_v35 }
  0x4e   : > { %605 = vmatmul.mubr.bf16.vlgmr.msra.gmra.mrb[0].mxu0 %v357_v33  ;;  %646 = vmatmul.mubr.bf16.vlgmr.msra.gmra.mrb[0].mxu1 %v357_v33 }
  0x4f   : > { %1262 = vmatpush3.bf16.msra.mxu0 %v1393_v36  ;;  %1284 = vmatpush3.bf16.msra.mxu1 %v1394_v37 }
  0x50   : > { %1263 = vmatprep.subr.bf16.mxu0 %v1395_v38  ;;  %1285 = vmatprep.subr.bf16.mxu1 %v1396_v39 }
  0x53   : > { %1264 = vmatpush3.bf16.msra.mxu0 %v1397_v40  ;;  %1286 = vmatpush3.bf16.msra.mxu1 %v1398_v41 }
  0x54   : > { %1265 = vmatprep.subr.bf16.mxu0 %v1399_v42  ;;  %1287 = vmatprep.subr.bf16.mxu1 %v1400_v43 }
  0x57   : > { %1266 = vmatpush3.bf16.msra.mxu0 %v1401_v44  ;;  %1288 = vmatpush3.bf16.msra.mxu1 %v1402_v45 }
  0x58   : > { %1267 = vmatprep.subr.bf16.mxu0 %v1403_v46  ;;  %1289 = vmatprep.subr.bf16.mxu1 %v1404_v47 }
  0x5b   : > { %1268 = vmatpush3.bf16.msra.mxu0 %v1405_v48  ;;  %1290 = vmatpush3.bf16.msra.mxu1 %v1406_v49 }
  0x5c   : > { %1269 = vmatprep.subr.bf16.mxu0 %v1407_v50  ;;  %1291 = vmatprep.subr.bf16.mxu1 %v1408_v51 }
  0x5f   : > { %1270 = vmatpush3.bf16.msra.mxu0 %v1409_v52  ;;  %1292 = vmatpush3.bf16.msra.mxu1 %v1410_v53 }
  0x60   : > { %1271 = vmatprep.subr.bf16.mxu0 %v1411_v54  ;;  %1293 = vmatprep.subr.bf16.mxu1 %v1412_v55 }
  0x63   : > { %1272 = vmatpush3.bf16.msra.mxu0 %v1413_v56  ;;  %1294 = vmatpush3.bf16.msra.mxu1 %v1414_v57 }
  0x64   : > { %1273 = vmatprep.subr.bf16.mxu0 %v1415_v58  ;;  %1295 = vmatprep.subr.bf16.mxu1 %v1416_v59 }
  0x67   : > { %1274 = vmatpush3.bf16.msra.mxu0 %v1417_v60  ;;  %1296 = vmatpush3.bf16.msra.mxu1 %v1418_v61 }
  0x68   : > { %1275 = vmatprep.subr.bf16.mxu0 %v1419_v62  ;;  %1297 = vmatprep.subr.bf16.mxu1 %v1420_v63 }
  0x6b   : > { %1276 = vmatpush3.bf16.msra.mxu0 %v1421_v0  ;;  %1298 = vmatpush3.bf16.msra.mxu1 %v1422_v1 }
 0x121   : > { %v606_v13 = vpop.f32.mrb[0].mxu0  ;;  %v647_v14 = vpop.f32.mrb[0].mxu1 }
 0x122   : > { %v607_v15 = vadd.f32 %v606_v13, %v395_v9  ;;  %v648_v16 = vadd.f32 %v647_v14, %v403_v10  ;;  %v608_v17 = vpop.f32.mrb[1].mxu0  ;;  %v649_v18 = vpop.f32.mrb[1].mxu1  ;;  %v1046_v14 = vunpack.c.l.bf16 %v1045_v7 }
 0x123   : > { %v609_v19 = vadd.f32 %v608_v17, %v399_v11  ;;  %v650_v20 = vadd.f32 %v649_v18, %v407_v12  ;;  %v610_v21 = vpop.f32.mrb[2].mxu0  ;;  %v651_v22 = vpop.f32.mrb[2].mxu1  ;;  %v1256_v12 = vld [vmem:[%s1732_s4] ss:$0 sm:$0xff] }
 0x124   : > { %v658_v23 = vmul.f32 0.044715, %v607_v15  ;;  %v660_v24 = vmul.f32 0.044715, %v648_v16  ;;  %v611_v25 = vpop.f32.mrb[3].mxu0  ;;  %v652_v26 = vpop.f32.mrb[3].mxu1 }
 0x125   : > { %v659_v27 = vmul.f32 0.044715, %v609_v19  ;;  %v661_v28 = vmul.f32 0.044715, %v650_v20  ;;  %v654_v47 = vmul.f32 0.5, %v607_v15  ;;  %v655_v50 = vmul.f32 0.5, %v609_v19 }
 0x126   : > { %v662_v29 = vmul.f32 %v658_v23, %v607_v15  ;;  %v664_v30 = vmul.f32 %v660_v24, %v648_v16  ;;  %v657_v53 = vmul.f32 0.5, %v650_v20  ;;  %v656_v57 = vmul.f32 0.5, %v648_v16  ;;  %v1257_v25 = vld [vmem:[%s1733_s5] ss:$0 sm:$0xff] }
 0x127   : > { %v663_v31 = vmul.f32 %v659_v27, %v609_v19  ;;  %v665_v32 = vmul.f32 %v661_v28, %v650_v20  ;;  %v1258_v27 = vld [vmem:[%s1734_s6] ss:$0 sm:$0xff] }
 0x128   : > { %v666_v33 = vmul.f32 %v662_v29, %v607_v15  ;;  %v668_v34 = vmul.f32 %v664_v30, %v648_v16 }
 0x129   : > { %v667_v35 = vmul.f32 %v663_v31, %v609_v19  ;;  %v669_v36 = vmul.f32 %v665_v32, %v650_v20 }
 0x12a   : > { %v670_v37 = vadd.f32 %v666_v33, %v607_v15  ;;  %v672_v38 = vadd.f32 %v668_v34, %v648_v16 }
 0x12b   : > { %v671_v39 = vadd.f32 %v667_v35, %v609_v19  ;;  %v673_v40 = vadd.f32 %v669_v36, %v650_v20 }
 0x12c   : > { %v674_v41 = vmul.f32 0.7978846, %v670_v37  ;;  %v676_v44 = vmul.f32 0.7978846, %v672_v38 }
 0x12d   : > { %v675_v42 = vmul.f32 0.7978846, %v671_v39  ;;  %v677_v43 = vmul.f32 0.7978846, %v673_v40 }
 0x12e   : > { %1423 = vtanh.f32 %v674_v41 }
 0x12f   : > { %1425 = vtanh.f32 %v675_v42 }
 0x130   : > { %1427 = vtanh.f32 %v677_v43 }
 0x131   : > { %1429 = vtanh.f32 %v676_v44 }
 0x138   : > { %v1424_v45 = vpop.eup %1423 }
 0x139   : > { %v1426_v46 = vpop.eup %1425  ;;  %v682_v48 = vadd.f32 1.0, %v1424_v45 }
 0x13a   : > { %v1428_v49 = vpop.eup %1427  ;;  %v683_v51 = vadd.f32 1.0, %v1426_v46 }
 0x13b   : > { %v1430_v52 = vpop.eup %1429  ;;  %v685_v54 = vadd.f32 1.0, %v1428_v49  ;;  %v686_v55 = vmul.f32 %v682_v48, %v654_v47 }
 0x13c   : > { %v687_v56 = vmul.f32 %v683_v51, %v655_v50  ;;  %v684_v58 = vadd.f32 1.0, %v1430_v52 }
 0x13d   : > { %v689_v59 = vmul.f32 %v685_v54, %v657_v53  ;;  %v691_v63 = vpack.c.bf16 %v686_v55, %v686_v55 }
 0x13e   : > { %v692_v60 = vpack.c.bf16 %v687_v56, %v687_v56  ;;  %v688_v61 = vmul.f32 %v684_v58, %v656_v57 }
 0x13f   : > { %v694_v62 = vpack.c.bf16 %v689_v59, %v689_v59 }
 0x140   : > { %983 = vmatprep.mubr.bf16.mxu0 %v692_v60  ;;  %v693_v0 = vpack.c.bf16 %v688_v61, %v688_v61 }
 0x141   : > { %1023 = vmatprep.mubr.bf16.mxu1 %v694_v62  ;;  %984 = vmatmul.mubr.bf16.vlgmr.msra.gmra.mrb[4].mxu0 %v691_v63 }
 0x142   : > { %1024 = vmatmul.mubr.bf16.vlgmr.msra.gmra.mrb[4].mxu1 %v693_v0 }
 0x214   : > { %v1277_v1 = vpop.f32.mrb[4].mxu0 }
 0x215   : > { %v1299_v2 = vpop.f32.mrb[4].mxu1  ;;  %v1278_v3 = vpop.f32.mrb[5].mxu0 }
 0x216   : > { %v1279_v4 = vadd.f32 %v1278_v3, %v1277_v1  ;;  %v1300_v5 = vpop.f32.mrb[5].mxu1  ;;  %v1280_v6 = vpop.f32.mrb[6].mxu0 }
 0x217   : > { %v1301_v8 = vadd.f32 %v1300_v5, %v1299_v2  ;;  %v1302_v9 = vpop.f32.mrb[6].mxu1  ;;  %v1281_v10 = vpop.f32.mrb[7].mxu0 }
 0x218   : > { %v1303_v11 = vpop.f32.mrb[7].mxu1 }
 0x219   : > { %v1026_v13 = vadd.f32 %v1301_v8, %v1279_v4 }
 0x21b   : > { %v1044_v15 = vadd.f32 %v1256_v12, %v1026_v13 }
 0x21d   : > { %v1047_v16 = vadd.f32 %v1046_v14, %v1044_v15 }
 0x21f   : > { %1048 = vadd.xlane.f32.xlu0 %v1047_v16 }
 0x2ac   : > { %v1049_v17 = vpop.xlane.xlu0 %1048 }
 0x2ad   : > { %v1051_v18 = vmul.f32 0.0078125, %v1049_v17 }
 0x2af   : > { %v1052_v19 = vsub.f32 %v1047_v16, %v1051_v18 }
 0x2b1   : > { %v1053_v20 = vmul.f32 %v1052_v19, %v1052_v19 }
 0x2b3   : > { %1054 = vadd.xlane.f32.xlu0 %v1053_v20 }
 0x340   : > { %v1055_v21 = vpop.xlane.xlu0 %1054 }
 0x341   : > { %v1056_v22 = vmul.f32 0.0078125, %v1055_v21 }
 0x343   : > { %v1057_v23 = vadd.f32 1e-06, %v1056_v22 }
 0x345   : > { %1431 = vrsqrt.f32 %v1057_v23 }
 0x34f   : > { %v1432_v24 = vpop.eup %1431 }
 0x350   : > { %v1059_v26 = vmul.f32 %v1432_v24, %v1052_v19 }
 0x352   : > { %v1067_v28 = vmul.f32 %v1257_v25, %v1059_v26 }
 0x354   : > { %v1075_v29 = vadd.f32 %v1258_v27, %v1067_v28 }
 0x356   : > { %v1076_v30 = vpack.c.bf16 %v1075_v29, %v1075_v29 }
 0x358   : > { %1077 = vst [vmem:[%s350_s10] sm:$0xf] %v1076_v30 }
 0x359 PF: > { %s18_s26 = sadd.s32 1, %s1487_s26   ;;  %s1744_s24 = smov %s1483_s25 }
 0x35a   : > { %p15_p4 = scmp.ge.s32.totalorder %s18_s26, 4   ;;  %s1745_s25 = smov %s1747_s28 }
 0x35c   :  { %17 = sbr.rel (!%p15_p4) target bundleno = 2 (0x2), region = 98 }
 0x363   :  { %1097 = vsyncpa [#allocation4], 1 }
 0x364   :  { %1099 = vsyncpa [#allocation4 + $0x1], 1 }

// kernel: _encoder_forward.12
= control target key start
LH: loop header
LB: loop body
LE: loop exit
PB: predicated region body
PF: predicated region fallthrough
CT: control target
= control target key end

     0   :  { %s790_s12 = smov 0   ;;  %s792_s13 = smov 0   ;;  %s906_s0 = inlined_call_operand.vmem [shape: bf16[16,128], index: 0, kind: input, shape index: {}]   ;;  %s907_s1 = inlined_call_operand.vmem [shape: bf16[128,384], index: 1, kind: input, shape index: {}]   ;;  %s908_s2 = inlined_call_operand.vmem [shape: f32[1,384], index: 2, kind: input, shape index: {}]   ;;  %s909_s3 = inlined_call_operand.vmem [shape: bf16[16,384], index: 3, kind: output, shape index: {}]  }
   0x1   :  { %s794_s14 = smov 0  }
   0x2 LB: > { %s25_s15 = sadd.s32 1, %s761_s13  ;;  %p621_p0 = scmp.ge.s32.totalorder %s765_s14, 1  ;;  %s765_s14 = sphi %s794_s14, %s13_s14   ;;  %s761_s13 = sphi %s792_s13, %s911_s13   ;;  %s757_s12 = sphi %s790_s12, %s910_s12  }
   0x3   : > { %p27_p1 = scmp.ge.s32.totalorder %s25_s15, 2  ;;  %p171_p2 = scmp.lt.s32.totalorder %s765_s14, 3 }
   0x5   : > { %s913_s15 = smov (%p27_p1, %s25_s15), 0  ;;  %p172_p3 = pnand %p621_p0, %p171_p2 }
   0x6   : > { %v711_v0 = vld [vmem:[%s907_s1 + $0x4] ss:$12 sps:$4 sm:$0xff] (!%p172_p3)   ;;  %v767_v1 = vmov (!%p172_p3), 0.0   ;;  %v713_v2 = vld [vmem:[%s907_s1 + $0x8] ss:$12 sps:$4 sm:$0xff] (!%p172_p3)   ;;  %vm768_vm0 = vmmov (!%p172_p3), 0   ;;  %v268_v27 = vlaneseq (!%p172_p3) }
   0x7   : > { %175 = sbr.rel (%p172_p3) target bundleno = 258 (0x102), region = 32  ;;  %663 = vmatprep.subr.bf16.mxu1 (!%p172_p3), %v767_v1  ;;  %679 = vmatprep.mubr.msk.bf16.mxu1 (!%p172_p3), %vm768_vm0, %v767_v1  ;;  %v714_v3 = vld [vmem:[%s907_s1] ss:$12 sps:$4 sm:$0xff] (!%p172_p3)   ;;  %v715_v4 = vld [vmem:[%s907_s1 + $0x1c] ss:$12 sps:$4 sm:$0xff] (!%p172_p3)   ;;  %v769_v5 = vmov (!%p172_p3), 0  }
   0x8   : > { %411 = vmatprep.subr.bf16.mxu0 (!%p172_p3), %v711_v0  ;;  %664 = vmatpush3.bf16.msra.mxu1 (!%p172_p3), %v713_v2  ;;  %v717_v6 = vld [vmem:[%s907_s1 + $0x20] ss:$12 sps:$4 sm:$0xff] (!%p172_p3)   ;;  %v718_v7 = vld [vmem:[%s907_s1 + $0x18] ss:$12 sps:$4 sm:$0xff] (!%p172_p3)   ;;  %v722_v10 = vld [vmem:[%s907_s1 + $0x30] ss:$12 sps:$4 sm:$0xff] (!%p172_p3)  }
   0x9   : > { %443 = vmatprep.mubr.bf16.mxu0 (!%p172_p3), %v769_v5  ;;  %412 = vmatpush1.bf16.msra.mxu0 (!%p172_p3), %v714_v3  ;;  %v719_v8 = vld [vmem:[%s907_s1 + $0x34] ss:$12 sps:$4 sm:$0xff] (!%p172_p3)   ;;  %v721_v9 = vld [vmem:[%s907_s1 + $0x38] ss:$12 sps:$4 sm:$0xff] (!%p172_p3)   ;;  %v725_v12 = vld [vmem:[%s907_s1 + $0x50] ss:$12 sps:$4 sm:$0xff] (!%p172_p3)  }
   0xa   : > { %665 = vmatprep.subr.bf16.mxu1 (!%p172_p3), %v767_v1  ;;  %413 = vmatprep.subr.bf16.mxu0 (!%p172_p3), %v715_v4  ;;  %v723_v11 = vld [vmem:[%s907_s1 + $0x4c] ss:$12 sps:$4 sm:$0xff] (!%p172_p3)   ;;  %v726_v13 = vld [vmem:[%s907_s1 + $0x48] ss:$12 sps:$4 sm:$0xff] (!%p172_p3)   ;;  %v727_v14 = vld [vmem:[%s907_s1 + $0x64] ss:$12 sps:$4 sm:$0xff] (!%p172_p3)  }
   0xb   : > { %v729_v15 = vld [vmem:[%s907_s1 + $0x68] ss:$12 sps:$4 sm:$0xff] (!%p172_p3)   ;;  %v730_v16 = vld [vmem:[%s907_s1 + $0x60] ss:$12 sps:$4 sm:$0xff] (!%p172_p3)   ;;  %p207_p4 = scmp.lt.s32.totalorder (!%p172_p3), %s757_s12, 1  ;;  %v269_v28 = vshrl.u32 (!%p172_p3), %v268_v27, 7 }
   0xc   : > { %666 = vmatpush3.bf16.msra.mxu1 (!%p172_p3), %v717_v6  ;;  %v731_v17 = vld [vmem:[%s907_s1 + $0x7c] ss:$12 sps:$4 sm:$0xff] (!%p172_p3)   ;;  %v733_v18 = vld [vmem:[%s907_s1 + $0x80] ss:$12 sps:$4 sm:$0xff] (!%p172_p3)   ;;  %v734_v19 = vld [vmem:[%s907_s1 + $0x78] ss:$12 sps:$4 sm:$0xff] (!%p172_p3)  }
   0xd   : > { %414 = vmatpush1.bf16.msra.mxu0 (!%p172_p3), %v718_v7  ;;  %667 = vmatprep.subr.bf16.mxu1 (!%p172_p3), %v767_v1  ;;  %v735_v20 = vld [vmem:[%s907_s1 + $0x94] ss:$12 sps:$4 sm:$0xff] (!%p172_p3)   ;;  %v737_v21 = vld [vmem:[%s907_s1 + $0x98] ss:$12 sps:$4 sm:$0xff] (!%p172_p3)   ;;  %v738_v22 = vld [vmem:[%s907_s1 + $0x90] ss:$12 sps:$4 sm:$0xff] (!%p172_p3)  }
   0xe   : > { %415 = vmatprep.subr.bf16.mxu0 %v719_v8  ;;  %s915_s12 = smov (!%p207_p4, %s757_s12), 1  ;;  %v739_v23 = vld [vmem:[%s907_s1 + $0xac] ss:$12 sps:$4 sm:$0xff]   ;;  %v741_v24 = vld [vmem:[%s907_s1 + $0xb0] ss:$12 sps:$4 sm:$0xff]   ;;  %v278_v29 = vsub.s32 2, %v269_v28 }
   0xf   : > { %s622_s10 = sshll.u32 %s915_s12, 2  ;;  %v742_v25 = vld [vmem:[%s907_s1 + $0xa8] ss:$12 sps:$4 sm:$0xff]   ;;  %v266_v30 = vld [vmem:[%s908_s2] sm:$0x7]  ;;  %v270_v31 = vsub.s32 0, %v269_v28 }
  0x10   : > { %668 = vmatpush3.bf16.msra.mxu1 %v721_v9  ;;  %s210_s21 = scalar_lea.vmem %s906_s0, %s622_s10  ;;  %v274_v32 = vsub.s32 1, %v269_v28  ;;  %v279_v33 = vrot.slane %v266_v30, %v278_v29  ;;  %s683_s24 = smul.u32 12, %s915_s12 }
  0x11   : > { %416 = vmatpush1.bf16.msra.mxu0 %v722_v10  ;;  %669 = vmatprep.subr.bf16.mxu1 %v767_v1  ;;  %v233_v26 = vld [vmem:[%s210_s21] sm:$0xf]  ;;  %v271_v34 = vrot.slane %v266_v30, %v270_v31 }
  0x12   : > { %417 = vmatprep.subr.bf16.mxu0 %v723_v11  ;;  %v275_v35 = vrot.slane %v266_v30, %v274_v32  ;;  %s230_s27 = scalar_lea.vmem %s909_s3, %s683_s24 }
  0x14   : > { %670 = vmatpush3.bf16.msra.mxu1 %v725_v12 }
  0x15   : > { %418 = vmatpush1.bf16.msra.mxu0 %v726_v13  ;;  %671 = vmatprep.subr.bf16.mxu1 %v767_v1 }
  0x16   : > { %419 = vmatprep.subr.bf16.mxu0 %v727_v14 }
  0x18   : > { %672 = vmatpush3.bf16.msra.mxu1 %v729_v15 }
  0x19   : > { %420 = vmatpush1.bf16.msra.mxu0 %v730_v16  ;;  %673 = vmatprep.subr.bf16.mxu1 %v767_v1 }
  0x1a   : > { %421 = vmatprep.subr.bf16.mxu0 %v731_v17 }
  0x1c   : > { %674 = vmatpush3.bf16.msra.mxu1 %v733_v18 }
  0x1d   : > { %422 = vmatpush1.bf16.msra.mxu0 %v734_v19  ;;  %675 = vmatprep.subr.bf16.mxu1 %v767_v1 }
  0x1e   : > { %423 = vmatprep.subr.bf16.mxu0 %v735_v20 }
  0x20   : > { %676 = vmatpush3.bf16.msra.mxu1 %v737_v21 }
  0x21   : > { %424 = vmatpush1.bf16.msra.mxu0 %v738_v22  ;;  %677 = vmatprep.subr.bf16.mxu1 %v767_v1 }
  0x22   : > { %425 = vmatprep.subr.bf16.mxu0 %v739_v23 }
  0x24   : > { %678 = vmatpush3.bf16.msra.mxu1 %v741_v24 }
  0x25   : > { %426 = vmatpush1.bf16.msra.mxu0 %v742_v25 }
  0x27   : > { %680 = vmatmul.mubr.bf16.vlgmr.msra.gmra.mrb[0].mxu1 %v233_v26 }
  0x28   : > { %444 = vmatmul.mubr.bf16.vlgmr.msra.gmra.mrb[0].mxu0 %v233_v26 }
  0xfa   : > { %v486_v36 = vpop.f32.mrb[0].mxu1 }
  0xfb   : > { %v487_v37 = vadd.f32 %v486_v36, %v279_v33  ;;  %v445_v38 = vpop.f32.mrb[0].mxu0  ;;  %v681_v39 = vpop.f32.mrb[1].mxu1 }
  0xfc   : > { %v446_v40 = vadd.f32 %v445_v38, %v271_v34  ;;  %v447_v41 = vpop.f32.mrb[1].mxu0  ;;  %v489_v42 = vpop.f32.mrb[2].mxu1 }
  0xfd   : > { %v653_v43 = vpack.c.bf16 %v487_v37, %v487_v37  ;;  %v448_v44 = vadd.f32 %v447_v41, %v275_v35  ;;  %v449_v45 = vpop.f32.mrb[2].mxu0  ;;  %v682_v46 = vpop.f32.mrb[3].mxu1 }
  0xfe   : > { %v450_v47 = vpop.f32.mrb[3].mxu0 }
  0xff   : > { %506 = vst [vmem:[%s230_s27 + $0x8] sm:$0xf] %v653_v43  ;;  %v652_v48 = vpack.c.bf16 %v448_v44, %v446_v40 }
 0x101   : > { %505 = vst [vmem:[%s230_s27] sm:$0xff] %v652_v48 }
 0x102 PF: > { %s13_s14 = sadd.s32 1, %s765_s14   ;;  %s910_s12 = smov %s761_s13 }
 0x103   : > { %p10_p5 = scmp.ge.s32.totalorder %s13_s14, 4   ;;  %s911_s13 = smov %s913_s15 }
 0x105   :  { %12 = sbr.rel (!%p10_p5) target bundleno = 2 (0x2), region = 68 }

// kernel: _encoder_forward.15
= control target key start
LH: loop header
LB: loop body
LE: loop exit
PB: predicated region body
PF: predicated region fallthrough
CT: control target
= control target key end

     0   :  { %s1483_s24 = smov 0   ;;  %s1485_s25 = smov 0   ;;  %s1735_s0 = inlined_call_operand.vmem [shape: bf16[16,128], index: 0, kind: input, shape index: {}]   ;;  %s1736_s1 = inlined_call_operand.vmem [shape: bf16[128,512], index: 1, kind: input, shape index: {}]   ;;  %s1737_s2 = inlined_call_operand.vmem [shape: f32[1,512], index: 2, kind: input, shape index: {}]   ;;  %s1738_s3 = inlined_call_operand.vmem [shape: bf16[512,128], index: 3, kind: input, shape index: {}]   ;;  %s1739_s4 = inlined_call_operand.vmem [shape: f32[1,128], index: 4, kind: input, shape index: {}]   ;;  %s1740_s5 = inlined_call_operand.vmem [shape: f32[1,128], index: 5, kind: input, shape index: {}]   ;;  %s1741_s6 = inlined_call_operand.vmem [shape: f32[1,128], index: 6, kind: input, shape index: {}]   ;;  %s1742_s7 = inlined_call_operand.vmem [shape: bf16[16,128], index: 7, kind: output, shape index: {}]  }
   0x1   :  { %s1487_s26 = smov 0  }
   0x2 LB: > { %s29_s27 = sadd.s32 1, %s1436_s25  ;;  %p1187_p0 = scmp.ge.s32.totalorder %s1440_s26, 1  ;;  %s1440_s26 = sphi %s1487_s26, %s17_s26   ;;  %s1436_s25 = sphi %s1485_s25, %s1744_s25   ;;  %s1432_s24 = sphi %s1483_s24, %s1743_s24  }
   0x3   : > { %p31_p1 = scmp.ge.s32.totalorder %s29_s27, 2  ;;  %p280_p2 = scmp.lt.s32.totalorder %s1440_s26, 3 }
   0x5   : > { %s1746_s27 = smov (%p31_p1, %s29_s27), 0  ;;  %p281_p3 = pnand %p1187_p0, %p280_p2 }
   0x6   : > { %v1328_v0 = vld [vmem:[%s1736_s1 + $0x4] ss:$16 sps:$4 sm:$0xff] (!%p281_p3)   ;;  %v1330_v1 = vld [vmem:[%s1736_s1 + $0xc] ss:$16 sps:$4 sm:$0xff] (!%p281_p3)   ;;  %v1442_v2 = vmov (!%p281_p3), 0   ;;  %p324_p4 = scmp.lt.s32.totalorder (!%p281_p3), %s1432_s24, 1 }
   0x7   : > { %284 = sbr.rel (%p281_p3) target bundleno = 819 (0x333), region = 48  ;;  %602 = vmatprep.mubr.bf16.mxu0 (!%p281_p3), %v1442_v2  ;;  %643 = vmatprep.mubr.bf16.mxu1 (!%p281_p3), %v1442_v2  ;;  %v1332_v3 = vld [vmem:[%s1736_s1] ss:$16 sps:$4 sm:$0xff] (!%p281_p3)   ;;  %v1333_v4 = vld [vmem:[%s1736_s1 + $0x8] ss:$16 sps:$4 sm:$0xff] (!%p281_p3)   ;;  %v390_v2 = vlaneseq (!%p281_p3) }
   0x8   : > { %570 = vmatprep.subr.bf16.mxu0 (!%p281_p3), %v1328_v0  ;;  %611 = vmatprep.subr.bf16.mxu1 (!%p281_p3), %v1330_v1  ;;  %v1334_v5 = vld [vmem:[%s1736_s1 + $0x24] ss:$16 sps:$4 sm:$0xff] (!%p281_p3)   ;;  %v1336_v6 = vld [vmem:[%s1736_s1 + $0x2c] ss:$16 sps:$4 sm:$0xff] (!%p281_p3)   ;;  %v1338_v7 = vld [vmem:[%s1736_s1 + $0x20] ss:$16 sps:$4 sm:$0xff] (!%p281_p3)  }
   0x9   : > { %571 = vmatpush1.bf16.msra.mxu0 (!%p281_p3), %v1332_v3  ;;  %612 = vmatpush1.bf16.msra.mxu1 (!%p281_p3), %v1333_v4  ;;  %v1339_v8 = vld [vmem:[%s1736_s1 + $0x28] ss:$16 sps:$4 sm:$0xff] (!%p281_p3)   ;;  %v1340_v9 = vld [vmem:[%s1736_s1 + $0x44] ss:$16 sps:$4 sm:$0xff] (!%p281_p3)   ;;  %v1342_v10 = vld [vmem:[%s1736_s1 + $0x4c] ss:$16 sps:$4 sm:$0xff] (!%p281_p3)  }
   0xa   : > { %572 = vmatprep.subr.bf16.mxu0 (!%p281_p3), %v1334_v5  ;;  %613 = vmatprep.subr.bf16.mxu1 (!%p281_p3), %v1336_v6  ;;  %v1344_v11 = vld [vmem:[%s1736_s1 + $0x40] ss:$16 sps:$4 sm:$0xff] (!%p281_p3)   ;;  %v1345_v12 = vld [vmem:[%s1736_s1 + $0x48] ss:$16 sps:$4 sm:$0xff] (!%p281_p3)   ;;  %v1346_v13 = vld [vmem:[%s1736_s1 + $0x64] ss:$16 sps:$4 sm:$0xff] (!%p281_p3)  }
   0xb   : > { %v1348_v14 = vld [vmem:[%s1736_s1 + $0x6c] ss:$16 sps:$4 sm:$0xff] (!%p281_p3)   ;;  %v1350_v15 = vld [vmem:[%s1736_s1 + $0x60] ss:$16 sps:$4 sm:$0xff] (!%p281_p3)   ;;  %v1351_v16 = vld [vmem:[%s1736_s1 + $0x68] ss:$16 sps:$4 sm:$0xff] (!%p281_p3)  }
   0xc   : > { %v1352_v17 = vld [vmem:[%s1736_s1 + $0x84] ss:$16 sps:$4 sm:$0xff] (!%p281_p3)   ;;  %v1354_v18 = vld [vmem:[%s1736_s1 + $0x8c] ss:$16 sps:$4 sm:$0xff] (!%p281_p3)   ;;  %v1356_v19 = vld [vmem:[%s1736_s1 + $0x80] ss:$16 sps:$4 sm:$0xff] (!%p281_p3)  }
   0xd   : > { %573 = vmatpush1.bf16.msra.mxu0 (!%p281_p3), %v1338_v7  ;;  %614 = vmatpush1.bf16.msra.mxu1 (!%p281_p3), %v1339_v8  ;;  %v1357_v20 = vld [vmem:[%s1736_s1 + $0x88] ss:$16 sps:$4 sm:$0xff] (!%p281_p3)   ;;  %v1358_v21 = vld [vmem:[%s1736_s1 + $0xa4] ss:$16 sps:$4 sm:$0xff] (!%p281_p3)   ;;  %v1360_v22 = vld [vmem:[%s1736_s1 + $0xac] ss:$16 sps:$4 sm:$0xff] (!%p281_p3)  }
   0xe   : > { %574 = vmatprep.subr.bf16.mxu0 %v1340_v9  ;;  %615 = vmatprep.subr.bf16.mxu1 %v1342_v10  ;;  %s1748_s24 = smov (!%p324_p4, %s1432_s24), 1  ;;  %v1362_v23 = vld [vmem:[%s1736_s1 + $0xa0] ss:$16 sps:$4 sm:$0xff]   ;;  %v1363_v24 = vld [vmem:[%s1736_s1 + $0xa8] ss:$16 sps:$4 sm:$0xff]   ;;  %v391_v3 = vshrl.u32 %v390_v2, 7 }
   0xf   : > { %v1364_v25 = vld [vmem:[%s1736_s1 + $0xc4] ss:$16 sps:$4 sm:$0xff]   ;;  %v1366_v26 = vld [vmem:[%s1736_s1 + $0xcc] ss:$16 sps:$4 sm:$0xff]   ;;  %s1188_s19 = sshll.u32 %s1748_s24, 2 }
  0x10   : > { %v1368_v27 = vld [vmem:[%s1736_s1 + $0xc0] ss:$16 sps:$4 sm:$0xff]   ;;  %v1369_v28 = vld [vmem:[%s1736_s1 + $0xc8] ss:$16 sps:$4 sm:$0xff]   ;;  %v1370_v29 = vld [vmem:[%s1736_s1 + $0xe4] ss:$16 sps:$4 sm:$0xff]   ;;  %s1609_s15 = scalar_lea.vmem %s1735_s0, %s1188_s19  ;;  %s348_s22 = scalar_lea.vmem %s1742_s7, %s1188_s19 }
  0x11   : > { %575 = vmatpush1.bf16.msra.mxu0 %v1344_v11  ;;  %616 = vmatpush1.bf16.msra.mxu1 %v1345_v12  ;;  %v1372_v30 = vld [vmem:[%s1736_s1 + $0xec] ss:$16 sps:$4 sm:$0xff]   ;;  %v1374_v31 = vld [vmem:[%s1736_s1 + $0xe0] ss:$16 sps:$4 sm:$0xff]   ;;  %v1375_v32 = vld [vmem:[%s1736_s1 + $0xe8] ss:$16 sps:$4 sm:$0xff]  }
  0x12   : > { %576 = vmatprep.subr.bf16.mxu0 %v1346_v13  ;;  %617 = vmatprep.subr.bf16.mxu1 %v1348_v14  ;;  %v355_v33 = vld [vmem:[%s1609_s15] sm:$0xf]  ;;  %v1380_v38 = vld [vmem:[%s1738_s3 + $0x48] sm:$0xff]   ;;  %v1384_v42 = vld [vmem:[%s1738_s3 + $0x50] sm:$0xff]   ;;  %v392_v4 = vsub.s32 0, %v391_v3  ;;  %v400_v5 = vsub.s32 2, %v391_v3 }
  0x13   : > { %v1376_v34 = vld [vmem:[%s1738_s3 + $0x40] sm:$0xff]   ;;  %v1381_v39 = vld [vmem:[%s1738_s3 + $0xc8] sm:$0xff]   ;;  %v1385_v43 = vld [vmem:[%s1738_s3 + $0xd0] sm:$0xff]   ;;  %v396_v7 = vsub.s32 1, %v391_v3  ;;  %v404_v8 = vsub.s32 3, %v391_v3 }
  0x14   : > { %v1377_v35 = vld [vmem:[%s1738_s3 + $0xc0] sm:$0xff]   ;;  %v1382_v40 = vld [vmem:[%s1738_s3 + $0x8] sm:$0xff]   ;;  %v1386_v44 = vld [vmem:[%s1738_s3 + $0x10] sm:$0xff]  }
  0x15   : > { %577 = vmatpush1.bf16.msra.mxu0 %v1350_v15  ;;  %618 = vmatpush1.bf16.msra.mxu1 %v1351_v16  ;;  %v1378_v36 = vld [vmem:[%s1738_s3] sm:$0xff]   ;;  %v1383_v41 = vld [vmem:[%s1738_s3 + $0x88] sm:$0xff]   ;;  %v1387_v45 = vld [vmem:[%s1738_s3 + $0x90] sm:$0xff]  }
  0x16   : > { %578 = vmatprep.subr.bf16.mxu0 %v1352_v17  ;;  %619 = vmatprep.subr.bf16.mxu1 %v1354_v18  ;;  %v1379_v37 = vld [vmem:[%s1738_s3 + $0x80] sm:$0xff]   ;;  %v1388_v46 = vld [vmem:[%s1738_s3 + $0x58] sm:$0xff]   ;;  %v1396_v54 = vld [vmem:[%s1738_s3 + $0x68] sm:$0xff]  }
  0x17   : > { %v1389_v47 = vld [vmem:[%s1738_s3 + $0xd8] sm:$0xff]   ;;  %v1392_v50 = vld [vmem:[%s1738_s3 + $0x60] sm:$0xff]   ;;  %v1397_v55 = vld [vmem:[%s1738_s3 + $0xe8] sm:$0xff]  }
  0x18   : > { %v1390_v48 = vld [vmem:[%s1738_s3 + $0x18] sm:$0xff]   ;;  %v1393_v51 = vld [vmem:[%s1738_s3 + $0xe0] sm:$0xff]   ;;  %v1398_v56 = vld [vmem:[%s1738_s3 + $0x28] sm:$0xff]  }
  0x19   : > { %579 = vmatpush1.bf16.msra.mxu0 %v1356_v19  ;;  %620 = vmatpush1.bf16.msra.mxu1 %v1357_v20  ;;  %v1391_v49 = vld [vmem:[%s1738_s3 + $0x98] sm:$0xff]   ;;  %v1394_v52 = vld [vmem:[%s1738_s3 + $0x20] sm:$0xff]   ;;  %v1399_v57 = vld [vmem:[%s1738_s3 + $0xa8] sm:$0xff]  }
  0x1a   : > { %580 = vmatprep.subr.bf16.mxu0 %v1358_v21  ;;  %621 = vmatprep.subr.bf16.mxu1 %v1360_v22  ;;  %v1395_v53 = vld [vmem:[%s1738_s3 + $0xa0] sm:$0xff]   ;;  %v1400_v58 = vld [vmem:[%s1738_s3 + $0x70] sm:$0xff]   ;;  %v1404_v62 = vld [vmem:[%s1738_s3 + $0x78] sm:$0xff]  }
  0x1b   : > { %v1401_v59 = vld [vmem:[%s1738_s3 + $0xf0] sm:$0xff]   ;;  %v1405_v63 = vld [vmem:[%s1738_s3 + $0xf8] sm:$0xff]   ;;  %v388_v6 = vld [vmem:[%s1737_s2] sm:$0xf] }
  0x1c   : > { %v1402_v60 = vld [vmem:[%s1738_s3 + $0x30] sm:$0xff]   ;;  %v1406_v0 = vld [vmem:[%s1738_s3 + $0x38] sm:$0xff]   ;;  %v393_v9 = vrot.slane %v388_v6, %v392_v4  ;;  %v401_v10 = vrot.slane %v388_v6, %v400_v5  ;;  %v397_v11 = vrot.slane %v388_v6, %v396_v7  ;;  %v405_v12 = vrot.slane %v388_v6, %v404_v8  ;;  %v1043_v7 = vld [vmem:[%s1609_s15] sm:$0xf] }
  0x1d   : > { %581 = vmatpush1.bf16.msra.mxu0 %v1362_v23  ;;  %622 = vmatpush1.bf16.msra.mxu1 %v1363_v24  ;;  %v1403_v61 = vld [vmem:[%s1738_s3 + $0xb0] sm:$0xff]   ;;  %v1407_v1 = vld [vmem:[%s1738_s3 + $0xb8] sm:$0xff]  }
  0x1e   : > { %582 = vmatprep.subr.bf16.mxu0 %v1364_v25  ;;  %623 = vmatprep.subr.bf16.mxu1 %v1366_v26 }
  0x21   : > { %583 = vmatpush1.bf16.msra.mxu0 %v1368_v27  ;;  %624 = vmatpush1.bf16.msra.mxu1 %v1369_v28 }
  0x22   : > { %584 = vmatprep.subr.bf16.mxu0 %v1370_v29  ;;  %625 = vmatprep.subr.bf16.mxu1 %v1372_v30 }
  0x25   : > { %585 = vmatpush1.bf16.msra.mxu0 %v1374_v31  ;;  %626 = vmatpush1.bf16.msra.mxu1 %v1375_v32 }
  0x26   : > { %1259 = vmatprep.subr.bf16.mxu0 %v1376_v34  ;;  %1281 = vmatprep.subr.bf16.mxu1 %v1377_v35 }
  0x28   : > { %603 = vmatmul.mubr.bf16.vlgmr.msra.gmra.mrb[0].mxu0 %v355_v33  ;;  %644 = vmatmul.mubr.bf16.vlgmr.msra.gmra.mrb[0].mxu1 %v355_v33 }
  0x29   : > { %1260 = vmatpush3.bf16.msra.mxu0 %v1378_v36  ;;  %1282 = vmatpush3.bf16.msra.mxu1 %v1379_v37 }
  0x2a   : > { %1261 = vmatprep.subr.bf16.mxu0 %v1380_v38  ;;  %1283 = vmatprep.subr.bf16.mxu1 %v1381_v39 }
  0x2d   : > { %1262 = vmatpush3.bf16.msra.mxu0 %v1382_v40  ;;  %1284 = vmatpush3.bf16.msra.mxu1 %v1383_v41 }
  0x2e   : > { %1263 = vmatprep.subr.bf16.mxu0 %v1384_v42  ;;  %1285 = vmatprep.subr.bf16.mxu1 %v1385_v43 }
  0x31   : > { %1264 = vmatpush3.bf16.msra.mxu0 %v1386_v44  ;;  %1286 = vmatpush3.bf16.msra.mxu1 %v1387_v45 }
  0x32   : > { %1265 = vmatprep.subr.bf16.mxu0 %v1388_v46  ;;  %1287 = vmatprep.subr.bf16.mxu1 %v1389_v47 }
  0x35   : > { %1266 = vmatpush3.bf16.msra.mxu0 %v1390_v48  ;;  %1288 = vmatpush3.bf16.msra.mxu1 %v1391_v49 }
  0x36   : > { %1267 = vmatprep.subr.bf16.mxu0 %v1392_v50  ;;  %1289 = vmatprep.subr.bf16.mxu1 %v1393_v51 }
  0x39   : > { %1268 = vmatpush3.bf16.msra.mxu0 %v1394_v52  ;;  %1290 = vmatpush3.bf16.msra.mxu1 %v1395_v53 }
  0x3a   : > { %1269 = vmatprep.subr.bf16.mxu0 %v1396_v54  ;;  %1291 = vmatprep.subr.bf16.mxu1 %v1397_v55 }
  0x3d   : > { %1270 = vmatpush3.bf16.msra.mxu0 %v1398_v56  ;;  %1292 = vmatpush3.bf16.msra.mxu1 %v1399_v57 }
  0x3e   : > { %1271 = vmatprep.subr.bf16.mxu0 %v1400_v58  ;;  %1293 = vmatprep.subr.bf16.mxu1 %v1401_v59 }
  0x41   : > { %1272 = vmatpush3.bf16.msra.mxu0 %v1402_v60  ;;  %1294 = vmatpush3.bf16.msra.mxu1 %v1403_v61 }
  0x42   : > { %1273 = vmatprep.subr.bf16.mxu0 %v1404_v62  ;;  %1295 = vmatprep.subr.bf16.mxu1 %v1405_v63 }
  0x45   : > { %1274 = vmatpush3.bf16.msra.mxu0 %v1406_v0  ;;  %1296 = vmatpush3.bf16.msra.mxu1 %v1407_v1 }
  0xfb   : > { %v604_v13 = vpop.f32.mrb[0].mxu0  ;;  %v645_v14 = vpop.f32.mrb[0].mxu1 }
  0xfc   : > { %v605_v15 = vadd.f32 %v604_v13, %v393_v9  ;;  %v646_v16 = vadd.f32 %v645_v14, %v401_v10  ;;  %v606_v17 = vpop.f32.mrb[1].mxu0  ;;  %v647_v18 = vpop.f32.mrb[1].mxu1  ;;  %v1044_v14 = vunpack.c.l.bf16 %v1043_v7 }
  0xfd   : > { %v607_v19 = vadd.f32 %v606_v17, %v397_v11  ;;  %v648_v20 = vadd.f32 %v647_v18, %v405_v12  ;;  %v608_v21 = vpop.f32.mrb[2].mxu0  ;;  %v649_v22 = vpop.f32.mrb[2].mxu1  ;;  %v1254_v12 = vld [vmem:[%s1739_s4] ss:$0 sm:$0xff] }
  0xfe   : > { %v656_v23 = vmul.f32 0.044715, %v605_v15  ;;  %v658_v24 = vmul.f32 0.044715, %v646_v16  ;;  %v609_v25 = vpop.f32.mrb[3].mxu0  ;;  %v650_v26 = vpop.f32.mrb[3].mxu1 }
  0xff   : > { %v657_v27 = vmul.f32 0.044715, %v607_v19  ;;  %v659_v28 = vmul.f32 0.044715, %v648_v20  ;;  %v652_v47 = vmul.f32 0.5, %v605_v15  ;;  %v653_v50 = vmul.f32 0.5, %v607_v19 }
 0x100   : > { %v660_v29 = vmul.f32 %v656_v23, %v605_v15  ;;  %v662_v30 = vmul.f32 %v658_v24, %v646_v16  ;;  %v655_v53 = vmul.f32 0.5, %v648_v20  ;;  %v654_v57 = vmul.f32 0.5, %v646_v16  ;;  %v1255_v25 = vld [vmem:[%s1740_s5] ss:$0 sm:$0xff] }
 0x101   : > { %v661_v31 = vmul.f32 %v657_v27, %v607_v19  ;;  %v663_v32 = vmul.f32 %v659_v28, %v648_v20  ;;  %v1256_v27 = vld [vmem:[%s1741_s6] ss:$0 sm:$0xff] }
 0x102   : > { %v664_v33 = vmul.f32 %v660_v29, %v605_v15  ;;  %v666_v34 = vmul.f32 %v662_v30, %v646_v16 }
 0x103   : > { %v665_v35 = vmul.f32 %v661_v31, %v607_v19  ;;  %v667_v36 = vmul.f32 %v663_v32, %v648_v20 }
 0x104   : > { %v668_v37 = vadd.f32 %v664_v33, %v605_v15  ;;  %v670_v38 = vadd.f32 %v666_v34, %v646_v16 }
 0x105   : > { %v669_v39 = vadd.f32 %v665_v35, %v607_v19  ;;  %v671_v40 = vadd.f32 %v667_v36, %v648_v20 }
 0x106   : > { %v672_v41 = vmul.f32 0.7978846, %v668_v37  ;;  %v674_v44 = vmul.f32 0.7978846, %v670_v38 }
 0x107   : > { %v673_v42 = vmul.f32 0.7978846, %v669_v39  ;;  %v675_v43 = vmul.f32 0.7978846, %v671_v40 }
 0x108   : > { %1408 = vtanh.f32 %v672_v41 }
 0x109   : > { %1410 = vtanh.f32 %v673_v42 }
 0x10a   : > { %1412 = vtanh.f32 %v675_v43 }
 0x10b   : > { %1414 = vtanh.f32 %v674_v44 }
 0x112   : > { %v1409_v45 = vpop.eup %1408 }
 0x113   : > { %v1411_v46 = vpop.eup %1410  ;;  %v680_v48 = vadd.f32 1.0, %v1409_v45 }
 0x114   : > { %v1413_v49 = vpop.eup %1412  ;;  %v681_v51 = vadd.f32 1.0, %v1411_v46 }
 0x115   : > { %v1415_v52 = vpop.eup %1414  ;;  %v683_v54 = vadd.f32 1.0, %v1413_v49  ;;  %v684_v55 = vmul.f32 %v680_v48, %v652_v47 }
 0x116   : > { %v685_v56 = vmul.f32 %v681_v51, %v653_v50  ;;  %v682_v58 = vadd.f32 1.0, %v1415_v52 }
 0x117   : > { %v687_v59 = vmul.f32 %v683_v54, %v655_v53  ;;  %v689_v63 = vpack.c.bf16 %v684_v55, %v684_v55 }
 0x118   : > { %v690_v60 = vpack.c.bf16 %v685_v56, %v685_v56  ;;  %v686_v61 = vmul.f32 %v682_v58, %v654_v57 }
 0x119   : > { %v692_v62 = vpack.c.bf16 %v687_v59, %v687_v59 }
 0x11a   : > { %981 = vmatprep.mubr.bf16.mxu0 %v690_v60  ;;  %v691_v0 = vpack.c.bf16 %v686_v61, %v686_v61 }
 0x11b   : > { %1021 = vmatprep.mubr.bf16.mxu1 %v692_v62  ;;  %982 = vmatmul.mubr.bf16.vlgmr.msra.gmra.mrb[4].mxu0 %v689_v63 }
 0x11c   : > { %1022 = vmatmul.mubr.bf16.vlgmr.msra.gmra.mrb[4].mxu1 %v691_v0 }
 0x1ee   : > { %v1275_v1 = vpop.f32.mrb[4].mxu0 }
 0x1ef   : > { %v1297_v2 = vpop.f32.mrb[4].mxu1  ;;  %v1276_v3 = vpop.f32.mrb[5].mxu0 }
 0x1f0   : > { %v1277_v4 = vadd.f32 %v1276_v3, %v1275_v1  ;;  %v1298_v5 = vpop.f32.mrb[5].mxu1  ;;  %v1278_v6 = vpop.f32.mrb[6].mxu0 }
 0x1f1   : > { %v1299_v8 = vadd.f32 %v1298_v5, %v1297_v2  ;;  %v1300_v9 = vpop.f32.mrb[6].mxu1  ;;  %v1279_v10 = vpop.f32.mrb[7].mxu0 }
 0x1f2   : > { %v1301_v11 = vpop.f32.mrb[7].mxu1 }
 0x1f3   : > { %v1024_v13 = vadd.f32 %v1299_v8, %v1277_v4 }
 0x1f5   : > { %v1042_v15 = vadd.f32 %v1254_v12, %v1024_v13 }
 0x1f7   : > { %v1045_v16 = vadd.f32 %v1044_v14, %v1042_v15 }
 0x1f9   : > { %1046 = vadd.xlane.f32.xlu0 %v1045_v16 }
 0x286   : > { %v1047_v17 = vpop.xlane.xlu0 %1046 }
 0x287   : > { %v1049_v18 = vmul.f32 0.0078125, %v1047_v17 }
 0x289   : > { %v1050_v19 = vsub.f32 %v1045_v16, %v1049_v18 }
 0x28b   : > { %v1051_v20 = vmul.f32 %v1050_v19, %v1050_v19 }
 0x28d   : > { %1052 = vadd.xlane.f32.xlu0 %v1051_v20 }
 0x31a   : > { %v1053_v21 = vpop.xlane.xlu0 %1052 }
 0x31b   : > { %v1054_v22 = vmul.f32 0.0078125, %v1053_v21 }
 0x31d   : > { %v1055_v23 = vadd.f32 1e-06, %v1054_v22 }
 0x31f   : > { %1416 = vrsqrt.f32 %v1055_v23 }
 0x329   : > { %v1417_v24 = vpop.eup %1416 }
 0x32a   : > { %v1057_v26 = vmul.f32 %v1417_v24, %v1050_v19 }
 0x32c   : > { %v1065_v28 = vmul.f32 %v1255_v25, %v1057_v26 }
 0x32e   : > { %v1073_v29 = vadd.f32 %v1256_v27, %v1065_v28 }
 0x330   : > { %v1074_v30 = vpack.c.bf16 %v1073_v29, %v1073_v29 }
 0x332   : > { %1075 = vst [vmem:[%s348_s22] sm:$0xf] %v1074_v30 }
 0x333 PF: > { %s17_s26 = sadd.s32 1, %s1440_s26   ;;  %s1743_s24 = smov %s1436_s25 }
 0x334   : > { %p14_p5 = scmp.ge.s32.totalorder %s17_s26, 4   ;;  %s1744_s25 = smov %s1746_s27 }
 0x336   :  { %16 = sbr.rel (!%p14_p5) target bundleno = 2 (0x2), region = 95 }

</bundles_post_ra>
